<compile_context>
chip_gen: v5e
topology: v5e:2x2
jax: 0.10.0
libtpu: 0.0.40
codegen_flags: <defaults>
</compile_context>

<pallas_src>
import functools

import jax
import jax.numpy as jnp
from jax.experimental import pallas as pl
from jax.experimental.pallas import tpu as pltpu

K_SIZE = 3
K_TAPS = K_SIZE * K_SIZE  # 9
LANES = 128
_VMEM_LIMIT = 32 * 1024 * 1024      # above v5e's 16 MiB scoped default, safe on v7x (64 MiB)
_TILE_BUDGET = 10 * 1024 * 1024     # per-grid-step block budget (double-buffer friendly)


def _pick_tile_n(n, per_col_bytes, budget=_TILE_BUDGET):
    """Largest multiple-of-128 lane tile dividing n whose VMEM footprint fits the budget."""
    for t in (8192, 4096, 2048, 1024, 512, 256, 128):
        if n % t == 0 and t * per_col_bytes <= budget:
            return t
    return n


# ----------------------------------------------------------------------------
# Glue: channel-first im2col (F.unfold order), k-means clustering, centroids
# ----------------------------------------------------------------------------
def im2col_cfirst(x):
    """x: (B, C, H, W) -> (B, C*9, H*W); row index = c*9 + kh*3 + kw (F.unfold order)."""
    B, C, H, W = x.shape
    xp = jnp.pad(x, ((0, 0), (0, 0), (1, 1), (1, 1)))
    taps = [xp[:, :, kh:kh + H, kw:kw + W]
            for kh in range(K_SIZE) for kw in range(K_SIZE)]
    return jnp.stack(taps, axis=2).reshape(B, C * K_TAPS, H * W)


def kmeans_assign(feat, k, iters=10):
    """feat: (B, N, C) -> (B, N) int32. Deterministic init; matmul-form distances.

    The (B, N, K) distance / one-hot intermediates are kept in bf16 (f32 accumulation)
    to tame wrapper-side HBM traffic.
    TODO(synk): fold assignment + centroid accumulation into a Pallas kernel.
    """
    B, N, C = feat.shape
    init = (jnp.arange(k) * N) // k
    cent0 = feat[:, init, :]                                   # (B, K, C) f32
    x2 = jnp.sum(feat * feat, axis=-1, keepdims=True)          # (B, N, 1)
    feat16 = feat.astype(jnp.bfloat16)

    def assign(cent):
        c2 = jnp.sum(cent * cent, axis=-1)                     # (B, K)
        xc = jnp.einsum("bnc,bkc->bnk", feat16, cent.astype(jnp.bfloat16),
                        preferred_element_type=jnp.float32)
        return jnp.argmin(x2 - 2.0 * xc + c2[:, None, :], axis=-1)

    def step(_, cent):
        a = assign(cent)
        oh = jax.nn.one_hot(a, k, dtype=jnp.bfloat16)          # (B, N, K)
        cnt = jnp.sum(oh, axis=1, dtype=jnp.float32)           # (B, K)
        s = jnp.einsum("bnk,bnc->bkc", oh, feat16, preferred_element_type=jnp.float32)
        new = s / jnp.maximum(cnt, 1.0)[..., None]
        return jnp.where(cnt[..., None] > 0, new, cent)

    cent = jax.lax.fori_loop(0, iters, step, cent0)
    return assign(cent).astype(jnp.int32)


def cluster_centroids(feat, idx, k):
    """Per-cluster mean feature (B, K, C) for a given assignment (bf16 one-hot, f32 acc)."""
    oh = jax.nn.one_hot(idx, k, dtype=jnp.bfloat16)            # (B, N, K)
    cnt = jnp.sum(oh, axis=1, dtype=jnp.float32)               # (B, K)
    s = jnp.einsum("bnk,bnc->bkc", oh, feat.astype(jnp.bfloat16),
                   preferred_element_type=jnp.float32)
    return s / jnp.maximum(cnt, 1.0)[..., None]


# ----------------------------------------------------------------------------
# Pallas kernel 1 (primary): CANConv with in-kernel 3x3 tap generation + residual
# ----------------------------------------------------------------------------
def _canconv_taps_kernel(i_ref, hc_ref, wc_ref, x_ref, g_ref, b_ref, wt_ref, o_ref,
                         *, H, W, KC):
    """out = x + sum_t W_t @ (shift_t(x) * gate_t[idx]) + bias[idx]; taps built via roll."""
    Np = x_ref.shape[-1]
    x = x_ref[0]                                                        # (C, Np) f32
    onehot = (jax.lax.broadcasted_iota(jnp.int32, (KC, Np), 0)
              == i_ref[0]).astype(jnp.bfloat16)                         # (KC, Np)
    hh = hc_ref[...]                                                    # (1, Np) i32
    ww = wc_ref[...]                                                    # (1, Np) i32
    gt = g_ref[0]                                                       # (9, C, KC) bf16
    wt = wt_ref[...]                                                    # (9, C, C)  bf16
    # per-pixel cluster bias via one-hot MXU gather (bf16 operands, f32 accumulation)
    acc = x + jnp.dot(b_ref[0], onehot, preferred_element_type=jnp.float32)   # (C, Np)
    for t in range(K_TAPS):
        dh, dw = t // K_SIZE - 1, t % K_SIZE - 1
        off = dh * W + dw
        gate = jnp.dot(gt[t], onehot, preferred_element_type=jnp.float32)     # (C, Np)
        tap = x if off == 0 else pltpu.roll(x, shift=(-off) % Np, axis=1)
        valid = (hh >= -dh) & (hh < H - dh) & (ww >= -dw) & (ww < W - dw)     # (1, Np)
        mod = (jnp.where(valid, tap, 0.0) * gate).astype(jnp.bfloat16)        # (C, Np)
        acc = acc + jnp.dot(wt[t], mod, preferred_element_type=jnp.float32)
    o_ref[0] = acc.astype(o_ref.dtype)


# ----------------------------------------------------------------------------
# Pallas kernel 2 (fallback, huge images): tiled bf16 materialized patches
# ----------------------------------------------------------------------------
def _canconv_patches_kernel(i_ref, p_ref, tab_ref, x_ref, w_ref, o_ref, *, CK, CKP):
    KC = tab_ref.shape[-1]
    TN = p_ref.shape[-1]
    onehot = (jax.lax.broadcasted_iota(jnp.int32, (KC, TN), 0)
              == i_ref[0]).astype(jnp.bfloat16)
    # single fused gather of per-cluster gate (rows :CK) and bias (rows CKP:) tables
    gathered = jnp.dot(tab_ref[0], onehot, preferred_element_type=jnp.float32)  # (CKP+C, TN)
    gate = gathered[:CK].astype(jnp.bfloat16)
    bias = gathered[CKP:]
    mod = p_ref[0] * gate                                                       # bf16
    y = jnp.dot(w_ref[...], mod, preferred_element_type=jnp.float32)            # (C, TN)
    o_ref[0] = (x_ref[0] + y + bias).astype(o_ref.dtype)


def canconv_residual(x, idx, gate, c_bias, base_w, cluster_num, *, force_patches=False):
    """x + CANConv(x) in channel-first layout.

    kernels[b,k] = diag(gate[b,k]) @ base_w
      =>  out = x + (patches * gate[idx]) @ base_w + bias[idx]
    x (B,C,H,W) f32, idx (B,N) i32, gate (B,K,CK), c_bias (B,K,C), base_w (CK,C).
    Returns (B, C, H*W) f32.
    """
    B, C, H, W = x.shape
    N = H * W
    KC = cluster_num
    CK = C * K_TAPS
    pad = (-N) % LANES
    Np = N + pad

    x_cn = x.reshape(B, C, N)
    if pad:
        x_cn = jnp.pad(x_cn, ((0, 0), (0, 0), (0, pad)))
        idx = jnp.pad(idx, ((0, 0), (0, pad)))
    idx3 = idx.reshape(B, 1, Np).astype(jnp.int32)

    # Primary path needs the whole (C, Np) image per batch in VMEM; otherwise fall back.
    taps_cols = 40 * C + 2 * KC + 32                    # rough per-lane VMEM bytes
    use_taps = (not force_patches) and Np * taps_cols <= _TILE_BUDGET

    if use_taps:
        hh = jnp.repeat(jnp.arange(H, dtype=jnp.int32), W)
        ww = jnp.tile(jnp.arange(W, dtype=jnp.int32), H)
        if pad:
            fill = jnp.full((pad,), -(1 << 20), jnp.int32)
            hh = jnp.concatenate([hh, fill])
            ww = jnp.concatenate([ww, fill])
        hh = hh.reshape(1, Np)
        ww = ww.reshape(1, Np)
        # tap-major tables so each tap's (C, .) slice is a clean leading-axis index
        gtab = gate.reshape(B, KC, C, K_TAPS).transpose(0, 3, 2, 1).astype(jnp.bfloat16)
        btab = c_bias.transpose(0, 2, 1).astype(jnp.bfloat16)                 # (B, C, KC)
        wtap = base_w.reshape(C, K_TAPS, C).transpose(1, 2, 0).astype(jnp.bfloat16)  # (9,Co,Ci)
        out = pl.pallas_call(
            functools.partial(_canconv_taps_kernel, H=H, W=W, KC=KC),
            out_shape=jax.ShapeDtypeStruct((B, C, Np), x.dtype),
            grid_spec=pltpu.PrefetchScalarGridSpec(
                num_scalar_prefetch=0,
                grid=(B,),
                in_specs=[
                    pl.BlockSpec((1, 1, Np), lambda b: (b, 0, 0)),            # idx
                    pl.BlockSpec((1, Np), lambda b: (0, 0)),                  # h coords
                    pl.BlockSpec((1, Np), lambda b: (0, 0)),                  # w coords
                    pl.BlockSpec((1, C, Np), lambda b: (b, 0, 0)),            # x (taps+residual)
                    pl.BlockSpec((1, K_TAPS, C, KC), lambda b: (b, 0, 0, 0)),  # gate table
                    pl.BlockSpec((1, C, KC), lambda b: (b, 0, 0)),            # bias table
                    pl.BlockSpec((K_TAPS, C, C), lambda b: (0, 0, 0)),        # base weights
                ],
                out_specs=pl.BlockSpec((1, C, Np), lambda b: (b, 0, 0)),
            ),
            compiler_params=pltpu.CompilerParams(
                dimension_semantics=("parallel",),
                vmem_limit_bytes=_VMEM_LIMIT),
        )(idx3, hh, ww, x_cn, gtab, btab, wtap)
    else:
        # TODO(synk): a halo-tiled in-kernel-taps variant would remove this bf16 patches
        #             stream for very large images as well.
        CKP = CK + (-CK) % 8
        patches = im2col_cfirst(x).astype(jnp.bfloat16)                        # (B, CK, N)
        if pad:
            patches = jnp.pad(patches, ((0, 0), (0, 0), (0, pad)))
        gate_t = jnp.pad(gate.transpose(0, 2, 1), ((0, 0), (0, CKP - CK), (0, 0)))
        tab = jnp.concatenate([gate_t, c_bias.transpose(0, 2, 1)],
                              axis=1).astype(jnp.bfloat16)                     # (B, CKP+C, KC)
        w_t = base_w.T.astype(jnp.bfloat16)                                    # (C, CK)
        per_col = 10 * CK + 16 * C + 2 * KC + 16
        TN = _pick_tile_n(Np, per_col)
        out = pl.pallas_call(
            functools.partial(_canconv_patches_kernel, CK=CK, CKP=CKP),
            out_shape=jax.ShapeDtypeStruct((B, C, Np), x.dtype),
            grid_spec=pltpu.PrefetchScalarGridSpec(
                num_scalar_prefetch=0,
                grid=(B, Np // TN),
                in_specs=[
                    pl.BlockSpec((1, 1, TN), lambda b, n: (b, 0, n)),          # idx
                    pl.BlockSpec((1, CK, TN), lambda b, n: (b, 0, n)),         # patches (bf16)
                    pl.BlockSpec((1, CKP + C, KC), lambda b, n: (b, 0, 0)),    # gate+bias table
                    pl.BlockSpec((1, C, TN), lambda b, n: (b, 0, n)),          # residual x
                    pl.BlockSpec((C, CK), lambda b, n: (0, 0)),                # shared weight
                ],
                out_specs=pl.BlockSpec((1, C, TN), lambda b, n: (b, 0, n)),
            ),
            compiler_params=pltpu.CompilerParams(
                dimension_semantics=("parallel", "parallel"),
                vmem_limit_bytes=_VMEM_LIMIT),
        )(idx3, patches, tab, x_cn, w_t)

    return out[:, :, :N] if pad else out


# ----------------------------------------------------------------------------
# Pallas kernel 3: fused LAGConv2D (attention conv + sigmoid + modulation + conv
#                  + bias) + ReLU.  conv1 of the block; its result is discarded by the
#                  reference forward -- kept for structural parity, smoke-tested only.
# ----------------------------------------------------------------------------
def _lagconv_relu_kernel(p_ref, aw_ref, ab_ref, e_ref, w_ref, b_ref, o_ref):
    p = p_ref[0]                                                        # (CK, TN) bf16
    logits = jnp.dot(aw_ref[...], p, preferred_element_type=jnp.float32) + ab_ref[...]
    att = jax.nn.sigmoid(logits).astype(jnp.bfloat16)                   # (9, TN)
    # broadcast the 9 per-tap attention rows over the C channel groups via a tiny matmul
    att_full = jnp.dot(e_ref[...], att, preferred_element_type=jnp.float32)   # (CK, TN)
    mod = p * att_full.astype(jnp.bfloat16)
    y = jnp.dot(w_ref[...], mod, preferred_element_type=jnp.float32)    # (C, TN)
    o_ref[0] = jnp.maximum(y + b_ref[0], 0.0).astype(o_ref.dtype)       # relu1 fused


def lagconv2d_relu_forward(params, x):
    """relu(LAGConv2D(x)) -- conv1+relu1 of CANCRB_Down (discarded by the reference)."""
    B, C, H, W = x.shape
    N = H * W
    CK = C * K_TAPS
    patches = im2col_cfirst(x).astype(jnp.bfloat16)                     # (B, CK, N)
    # global-bias branch from GAP of the LAGConv input
    # TODO(synk): exact LAGConv bias-generator internals approximated by a GAP->MLP branch.
    gap = x.mean(axis=(2, 3))                                           # (B, C)
    gbias = jax.nn.relu(gap @ params["lag_gb_w1"] + params["lag_gb_b1"]) \
        @ params["lag_gb_w2"] + params["lag_gb_b2"]
    bias_pb = (gbias + params["lag_bias"]).reshape(B, C, 1)
    expand = (jnp.arange(CK)[:, None] % K_TAPS
              == jnp.arange(K_TAPS)[None, :]).astype(jnp.bfloat16)      # (CK, 9)
    aw_t = params["lag_att_w"].T.astype(jnp.bfloat16)                   # (9, CK)
    ab = params["lag_att_b"].reshape(K_TAPS, 1)
    w_t = params["lag_w"].T.astype(jnp.bfloat16)                        # (C, CK)
    TN = _pick_tile_n(N, 8 * CK + 16 * C + 32)
    out = pl.pallas_call(
        _lagconv_relu_kernel,
        out_shape=jax.ShapeDtypeStruct((B, C, N), jnp.float32),
        grid_spec=pltpu.PrefetchScalarGridSpec(
            num_scalar_prefetch=0,
            grid=(B, N // TN),
            in_specs=[
                pl.BlockSpec((1, CK, TN), lambda b, n: (b, 0, n)),
                pl.BlockSpec((K_TAPS, CK), lambda b, n: (0, 0)),
                pl.BlockSpec((K_TAPS, 1), lambda b, n: (0, 0)),
                pl.BlockSpec((CK, K_TAPS), lambda b, n: (0, 0)),
                pl.BlockSpec((C, CK), lambda b, n: (0, 0)),
                pl.BlockSpec((1, C, 1), lambda b, n: (b, 0, 0)),
            ],
            out_specs=pl.BlockSpec((1, C, TN), lambda b, n: (b, 0, n)),
        ),
        compiler_params=pltpu.CompilerParams(
            dimension_semantics=("parallel", "parallel"),
            vmem_limit_bytes=_VMEM_LIMIT),
    )(patches, aw_t, ab, expand, w_t, bias_pb)
    return out.reshape(B, C, H, W)


# ----------------------------------------------------------------------------
# Parameters (deterministic synthetic init), tables, forward pass, f32 reference
# ----------------------------------------------------------------------------
def init_params(key, C, kg_hidden=16):
    CK = C * K_TAPS
    ks = jax.random.split(key, 8)
    nrm = lambda k, shp, sc: jax.random.normal(k, shp, jnp.float32) * sc
    return {
        # CANConv (conv2): shared base weight modulated per-cluster by a small MLP
        "can_base_w": nrm(ks[0], (CK, C), (2.0 / CK) ** 0.5),
        "can_kg_w1": nrm(ks[1], (C, kg_hidden), (2.0 / C) ** 0.5),
        "can_kg_b1": jnp.zeros((kg_hidden,), jnp.float32),
        "can_kg_w2": nrm(ks[2], (kg_hidden, CK), (2.0 / kg_hidden) ** 0.5),
        "can_kg_b2": jnp.zeros((CK,), jnp.float32),
        "can_bias_w": nrm(ks[3], (C, C), 0.01),
        "can_bias_b": jnp.zeros((C,), jnp.float32),
        # LAGConv2D (conv1)
        "lag_w": nrm(ks[4], (CK, C), (2.0 / CK) ** 0.5),
        "lag_att_w": nrm(ks[5], (CK, K_TAPS), (2.0 / CK) ** 0.5),
        "lag_att_b": jnp.zeros((K_TAPS,), jnp.float32),
        "lag_bias": jnp.zeros((C,), jnp.float32),
        "lag_gb_w1": nrm(ks[6], (C, C), (2.0 / C) ** 0.5),
        "lag_gb_b1": jnp.zeros((C,), jnp.float32),
        "lag_gb_w2": nrm(ks[7], (C, C), (2.0 / C) ** 0.5),
        "lag_gb_b2": jnp.zeros((C,), jnp.float32),
    }


def _canconv_tables(params, centroids):
    """Per-cluster channel gate (B,K,CK) and bias (B,K,C) from cluster-centroid features.
    TODO(synk): the exact CANConv KernelGenerator internals are approximated with a small
                gate MLP; the per-cluster adaptive-kernel structure (diag(gate)@base_w)
                is preserved."""
    h1 = jax.nn.relu(centroids @ params["can_kg_w1"] + params["can_kg_b1"])
    gate = jax.nn.sigmoid(h1 @ params["can_kg_w2"] + params["can_kg_b2"])   # (B, K, CK)
    c_bias = centroids @ params["can_bias_w"] + params["can_bias_b"]        # (B, K, C)
    return gate, c_bias


def cancrb_down_forward(params, x, cluster_num=32, cache_indice=None,
                        cluster_override=None, force_patches=False):
    """x: (B, C, H, W) float32. Returns (x + CANConv(x), idx) -- faithful to the reference,
    where conv1(x)'s result is overwritten by conv2(x) before use (so it does not affect
    the outputs; the fused LAGConv kernel is provided in lagconv2d_relu_forward)."""
    B, C, H, W = x.shape
    N = H * W
    feat = x.reshape(B, C, N).transpose(0, 2, 1)          # (B, N, C), cluster on channels
    if cluster_override is not None:
        idx = cluster_override.astype(jnp.int32).reshape(B, N)
    else:
        idx = kmeans_assign(feat, cluster_num)
    # TODO(synk): cache_indice (k-means warm-start cache used during training) is ignored.
    centroids = cluster_centroids(feat, idx, cluster_num)
    gate, c_bias = _canconv_tables(params, centroids)
    out_cn = canconv_residual(x, idx, gate, c_bias, params["can_base_w"], cluster_num,
                              force_patches=force_patches)
    return out_cn.reshape(B, C, H, W), idx


def cancrb_down_reference(params, x, cluster_num, idx):
    """Pure-JAX f32 reference of the live path (x + CANConv(x)) for a given clustering."""
    B, C, H, W = x.shape
    N = H * W
    x_cn = x.reshape(B, C, N)
    feat = x_cn.transpose(0, 2, 1)
    centroids = cluster_centroids(feat, idx, cluster_num)
    gate, c_bias = _canconv_tables(params, centroids)
    patches = im2col_cfirst(x)                                           # (B, CK, N) f32
    ohp = jax.nn.one_hot(idx, cluster_num, dtype=jnp.float32)            # (B, N, K)
    g_px = jnp.einsum("bnk,bkp->bpn", ohp, gate)                         # (B, CK, N)
    b_px = jnp.einsum("bnk,bkc->bcn", ohp, c_bias)                       # (B, C, N)
    y = jnp.einsum("cp,bpn->bcn", params["can_base_w"].T, patches * g_px,
                   precision="highest")
    return (x_cn + y + b_px).reshape(B, C, H, W)


# ----------------------------------------------------------------------------
if __name__ == "__main__":
    key = jax.random.PRNGKey(0)
    kx, kp = jax.random.split(key)
    B, C, H, W = 2, 4, 16, 16
    cluster_num = 8

    x = jax.random.normal(kx, (B, C, H, W), jnp.float32)
    params = init_params(kp, C)

    fwd = jax.jit(functools.partial(cancrb_down_forward, cluster_num=cluster_num))
    out, idx = fwd(params, x)
    jax.block_until_ready((out, idx))

    assert out.shape == (B, C, H, W) and out.dtype == jnp.float32
    assert idx.shape == (B, H * W) and idx.dtype == jnp.int32
    assert int(idx.min()) >= 0 and int(idx.max()) < cluster_num

    # Correctness: pure-JAX f32 reference of the output path, using the returned clustering.
    out_ref = cancrb_down_reference(params, x, cluster_num, idx)
    err = float(jnp.max(jnp.abs(out - out_ref)))
    assert err < 0.25, f"taps kernel / reference mismatch: max abs err {err}"

    # Also exercise the tiled bf16-patches fallback kernel (used for very large images),
    # pinning the clustering so all paths share identical per-cluster tables.
    fwd_fb = jax.jit(functools.partial(cancrb_down_forward, cluster_num=cluster_num,
                                       force_patches=True))
    out_fb, _ = fwd_fb(params, x, cluster_override=idx)
    jax.block_until_ready(out_fb)
    err_fb = float(jnp.max(jnp.abs(out_fb - out_ref)))
    assert err_fb < 0.25, f"patches kernel / reference mismatch: max abs err {err_fb}"

    # Smoke-test the fused LAGConv2D+ReLU kernel (conv1); its result is discarded by the
    # reference forward, so it is not on the jitted hot path above.
    lag = jax.jit(lagconv2d_relu_forward)(params, x)
    jax.block_until_ready(lag)
    assert lag.shape == (B, C, H, W)

    print("KERNEL_OK")
</pallas_src>

<mosaic_0001>
module attributes {stable_mosaic.version = 11 : i64} {
  func.func @_canconv_taps_kernel(%arg0: i32, %arg1: memref<1x1x256xi32, #tpu.memory_space<vmem>>, %arg2: memref<1x256xi32, #tpu.memory_space<vmem>>, %arg3: memref<1x256xi32, #tpu.memory_space<vmem>>, %arg4: memref<1x4x256xf32, #tpu.memory_space<vmem>>, %arg5: memref<1x9x4x8xbf16, #tpu.memory_space<vmem>>, %arg6: memref<1x4x8xbf16, #tpu.memory_space<vmem>>, %arg7: memref<9x4x4xbf16, #tpu.memory_space<vmem>>, %arg8: memref<1x4x256xf32, #tpu.memory_space<vmem>>) attributes {dimension_semantics = [#tpu.dimension_semantics<parallel>], iteration_bounds = array<i64: 2>, scalar_prefetch = 0 : i64, scratch_operands = 0 : i64, tpu.core_type = #tpu.core_type<tc>, window_params = [{transform_indices = @transform_0, window_bounds = array<i64: 1, 1, 256>}, {pipeline_mode = #tpu.pipeline_mode<synchronous>, transform_indices = @transform_1, window_bounds = array<i64: 1, 256>}, {pipeline_mode = #tpu.pipeline_mode<synchronous>, transform_indices = @transform_2, window_bounds = array<i64: 1, 256>}, {transform_indices = @transform_3, window_bounds = array<i64: 1, 4, 256>}, {transform_indices = @transform_4, window_bounds = array<i64: 1, 9, 4, 8>}, {transform_indices = @transform_5, window_bounds = array<i64: 1, 4, 8>}, {pipeline_mode = #tpu.pipeline_mode<synchronous>, transform_indices = @transform_6, window_bounds = array<i64: 9, 4, 4>}, {transform_indices = @transform_7, window_bounds = array<i64: 1, 4, 256>}]} {
    %c0 = arith.constant 0 : index
    %c0_0 = arith.constant 0 : index
    %c0_1 = arith.constant 0 : index
    %0 = vector.load %arg4[%c0, %c0_0, %c0_1] : memref<1x4x256xf32, #tpu.memory_space<vmem>>, vector<1x4x256xf32>
    %1 = vector.shape_cast %0 : vector<1x4x256xf32> to vector<4x256xf32>
    %2 = tpu.iota {dimensions = array<i32: 0>} : vector<8x256xi32>
    %c0_2 = arith.constant 0 : index
    %c0_3 = arith.constant 0 : index
    %c0_4 = arith.constant 0 : index
    %3 = vector.load %arg1[%c0_2, %c0_3, %c0_4] : memref<1x1x256xi32, #tpu.memory_space<vmem>>, vector<1x1x256xi32>
    %4 = vector.shape_cast %3 : vector<1x1x256xi32> to vector<1x256xi32>
    %5 = vector.broadcast %4 : vector<1x256xi32> to vector<8x256xi32>
    %6 = arith.cmpi eq, %2, %5 : vector<8x256xi32>
    %7 = arith.extui %6 : vector<8x256xi1> to vector<8x256xi32>
    %8 = arith.sitofp %7 : vector<8x256xi32> to vector<8x256xf32>
    %9 = arith.truncf %8 : vector<8x256xf32> to vector<8x256xbf16>
    %c0_5 = arith.constant 0 : index
    %c0_6 = arith.constant 0 : index
    %10 = vector.load %arg2[%c0_5, %c0_6] : memref<1x256xi32, #tpu.memory_space<vmem>>, vector<1x256xi32>
    %c0_7 = arith.constant 0 : index
    %c0_8 = arith.constant 0 : index
    %11 = vector.load %arg3[%c0_7, %c0_8] : memref<1x256xi32, #tpu.memory_space<vmem>>, vector<1x256xi32>
    %c0_9 = arith.constant 0 : index
    %c0_10 = arith.constant 0 : index
    %c0_11 = arith.constant 0 : index
    %c0_12 = arith.constant 0 : index
    %12 = vector.load %arg5[%c0_9, %c0_10, %c0_11, %c0_12] : memref<1x9x4x8xbf16, #tpu.memory_space<vmem>>, vector<1x9x4x8xbf16>
    %13 = vector.shape_cast %12 : vector<1x9x4x8xbf16> to vector<9x4x8xbf16>
    %c0_13 = arith.constant 0 : index
    %c0_14 = arith.constant 0 : index
    %c0_15 = arith.constant 0 : index
    %14 = vector.load %arg7[%c0_13, %c0_14, %c0_15] : memref<9x4x4xbf16, #tpu.memory_space<vmem>>, vector<9x4x4xbf16>
    %c0_16 = arith.constant 0 : index
    %c0_17 = arith.constant 0 : index
    %c0_18 = arith.constant 0 : index
    %15 = vector.load %arg6[%c0_16, %c0_17, %c0_18] : memref<1x4x8xbf16, #tpu.memory_space<vmem>>, vector<1x4x8xbf16>
    %16 = vector.shape_cast %15 : vector<1x4x8xbf16> to vector<4x8xbf16>
    %cst = arith.constant dense<0.000000e+00> : vector<4x256xf32>
    %17 = tpu.matmul %16, %9, %cst {dimension_numbers = #tpu.dot_dimension_numbers<[1], [0], [0], [1], [0, 0, 1, 1], [], []>} : vector<4x8xbf16>, vector<8x256xbf16>, vector<4x256xf32> -> vector<4x256xf32>
    %18 = arith.addf %1, %17 : vector<4x256xf32>
    %19 = vector.extract_strided_slice %13 {offsets = [0, 0, 0], sizes = [1, 4, 8], strides = [1, 1, 1]} : vector<9x4x8xbf16> to vector<1x4x8xbf16>
    %20 = vector.shape_cast %19 : vector<1x4x8xbf16> to vector<4x8xbf16>
    %cst_19 = arith.constant dense<0.000000e+00> : vector<4x256xf32>
    %21 = tpu.matmul %20, %9, %cst_19 {dimension_numbers = #tpu.dot_dimension_numbers<[1], [0], [0], [1], [0, 0, 1, 1], [], []>} : vector<4x8xbf16>, vector<8x256xbf16>, vector<4x256xf32> -> vector<4x256xf32>
    %c17_i32 = arith.constant 17 : i32
    %22 = tpu.dynamic_rotate %1 by %c17_i32 dim 1 : vector<4x256xf32>, i32 -> vector<4x256xf32>
    %c1_i32 = arith.constant 1 : i32
    %23 = vector.broadcast %c1_i32 : i32 to vector<1x256xi32>
    %24 = arith.cmpi sge, %10, %23 : vector<1x256xi32>
    %c17_i32_20 = arith.constant 17 : i32
    %25 = vector.broadcast %c17_i32_20 : i32 to vector<1x256xi32>
    %26 = arith.cmpi slt, %10, %25 : vector<1x256xi32>
    %27 = arith.andi %24, %26 : vector<1x256xi1>
    %c1_i32_21 = arith.constant 1 : i32
    %28 = vector.broadcast %c1_i32_21 : i32 to vector<1x256xi32>
    %29 = arith.cmpi sge, %11, %28 : vector<1x256xi32>
    %30 = arith.andi %27, %29 : vector<1x256xi1>
    %c17_i32_22 = arith.constant 17 : i32
    %31 = vector.broadcast %c17_i32_22 : i32 to vector<1x256xi32>
    %32 = arith.cmpi slt, %11, %31 : vector<1x256xi32>
    %33 = arith.andi %30, %32 : vector<1x256xi1>
    %cst_23 = arith.constant 0.000000e+00 : f32
    %34 = vector.shape_cast %33 : vector<1x256xi1> to vector<1x256xi1>
    %35 = vector.broadcast %34 : vector<1x256xi1> to vector<4x256xi1>
    %36 = vector.broadcast %cst_23 : f32 to vector<4x256xf32>
    %37 = arith.select %35, %22, %36 : vector<4x256xi1>, vector<4x256xf32>
    %38 = arith.mulf %37, %21 : vector<4x256xf32>
    %39 = arith.truncf %38 : vector<4x256xf32> to vector<4x256xbf16>
    %40 = vector.extract_strided_slice %14 {offsets = [0, 0, 0], sizes = [1, 4, 4], strides = [1, 1, 1]} : vector<9x4x4xbf16> to vector<1x4x4xbf16>
    %41 = vector.shape_cast %40 : vector<1x4x4xbf16> to vector<4x4xbf16>
    %cst_24 = arith.constant dense<0.000000e+00> : vector<4x256xf32>
    %42 = tpu.matmul %41, %39, %cst_24 {dimension_numbers = #tpu.dot_dimension_numbers<[1], [0], [0], [1], [0, 0, 1, 1], [], []>} : vector<4x4xbf16>, vector<4x256xbf16>, vector<4x256xf32> -> vector<4x256xf32>
    %43 = arith.addf %18, %42 : vector<4x256xf32>
    %44 = vector.extract_strided_slice %13 {offsets = [1, 0, 0], sizes = [1, 4, 8], strides = [1, 1, 1]} : vector<9x4x8xbf16> to vector<1x4x8xbf16>
    %45 = vector.shape_cast %44 : vector<1x4x8xbf16> to vector<4x8xbf16>
    %cst_25 = arith.constant dense<0.000000e+00> : vector<4x256xf32>
    %46 = tpu.matmul %45, %9, %cst_25 {dimension_numbers = #tpu.dot_dimension_numbers<[1], [0], [0], [1], [0, 0, 1, 1], [], []>} : vector<4x8xbf16>, vector<8x256xbf16>, vector<4x256xf32> -> vector<4x256xf32>
    %c16_i32 = arith.constant 16 : i32
    %47 = tpu.dynamic_rotate %1 by %c16_i32 dim 1 : vector<4x256xf32>, i32 -> vector<4x256xf32>
    %c1_i32_26 = arith.constant 1 : i32
    %48 = vector.broadcast %c1_i32_26 : i32 to vector<1x256xi32>
    %49 = arith.cmpi sge, %10, %48 : vector<1x256xi32>
    %c17_i32_27 = arith.constant 17 : i32
    %50 = vector.broadcast %c17_i32_27 : i32 to vector<1x256xi32>
    %51 = arith.cmpi slt, %10, %50 : vector<1x256xi32>
    %52 = arith.andi %49, %51 : vector<1x256xi1>
    %c0_i32 = arith.constant 0 : i32
    %53 = vector.broadcast %c0_i32 : i32 to vector<1x256xi32>
    %54 = arith.cmpi sge, %11, %53 : vector<1x256xi32>
    %55 = arith.andi %52, %54 : vector<1x256xi1>
    %c16_i32_28 = arith.constant 16 : i32
    %56 = vector.broadcast %c16_i32_28 : i32 to vector<1x256xi32>
    %57 = arith.cmpi slt, %11, %56 : vector<1x256xi32>
    %58 = arith.andi %55, %57 : vector<1x256xi1>
    %cst_29 = arith.constant 0.000000e+00 : f32
    %59 = vector.shape_cast %58 : vector<1x256xi1> to vector<1x256xi1>
    %60 = vector.broadcast %59 : vector<1x256xi1> to vector<4x256xi1>
    %61 = vector.broadcast %cst_29 : f32 to vector<4x256xf32>
    %62 = arith.select %60, %47, %61 : vector<4x256xi1>, vector<4x256xf32>
    %63 = arith.mulf %62, %46 : vector<4x256xf32>
    %64 = arith.truncf %63 : vector<4x256xf32> to vector<4x256xbf16>
    %65 = vector.extract_strided_slice %14 {offsets = [1, 0, 0], sizes = [1, 4, 4], strides = [1, 1, 1]} : vector<9x4x4xbf16> to vector<1x4x4xbf16>
    %66 = vector.shape_cast %65 : vector<1x4x4xbf16> to vector<4x4xbf16>
    %cst_30 = arith.constant dense<0.000000e+00> : vector<4x256xf32>
    %67 = tpu.matmul %66, %64, %cst_30 {dimension_numbers = #tpu.dot_dimension_numbers<[1], [0], [0], [1], [0, 0, 1, 1], [], []>} : vector<4x4xbf16>, vector<4x256xbf16>, vector<4x256xf32> -> vector<4x256xf32>
    %68 = arith.addf %43, %67 : vector<4x256xf32>
    %69 = vector.extract_strided_slice %13 {offsets = [2, 0, 0], sizes = [1, 4, 8], strides = [1, 1, 1]} : vector<9x4x8xbf16> to vector<1x4x8xbf16>
    %70 = vector.shape_cast %69 : vector<1x4x8xbf16> to vector<4x8xbf16>
    %cst_31 = arith.constant dense<0.000000e+00> : vector<4x256xf32>
    %71 = tpu.matmul %70, %9, %cst_31 {dimension_numbers = #tpu.dot_dimension_numbers<[1], [0], [0], [1], [0, 0, 1, 1], [], []>} : vector<4x8xbf16>, vector<8x256xbf16>, vector<4x256xf32> -> vector<4x256xf32>
    %c15_i32 = arith.constant 15 : i32
    %72 = tpu.dynamic_rotate %1 by %c15_i32 dim 1 : vector<4x256xf32>, i32 -> vector<4x256xf32>
    %c1_i32_32 = arith.constant 1 : i32
    %73 = vector.broadcast %c1_i32_32 : i32 to vector<1x256xi32>
    %74 = arith.cmpi sge, %10, %73 : vector<1x256xi32>
    %c17_i32_33 = arith.constant 17 : i32
    %75 = vector.broadcast %c17_i32_33 : i32 to vector<1x256xi32>
    %76 = arith.cmpi slt, %10, %75 : vector<1x256xi32>
    %77 = arith.andi %74, %76 : vector<1x256xi1>
    %c-1_i32 = arith.constant -1 : i32
    %78 = vector.broadcast %c-1_i32 : i32 to vector<1x256xi32>
    %79 = arith.cmpi sge, %11, %78 : vector<1x256xi32>
    %80 = arith.andi %77, %79 : vector<1x256xi1>
    %c15_i32_34 = arith.constant 15 : i32
    %81 = vector.broadcast %c15_i32_34 : i32 to vector<1x256xi32>
    %82 = arith.cmpi slt, %11, %81 : vector<1x256xi32>
    %83 = arith.andi %80, %82 : vector<1x256xi1>
    %cst_35 = arith.constant 0.000000e+00 : f32
    %84 = vector.shape_cast %83 : vector<1x256xi1> to vector<1x256xi1>
    %85 = vector.broadcast %84 : vector<1x256xi1> to vector<4x256xi1>
    %86 = vector.broadcast %cst_35 : f32 to vector<4x256xf32>
    %87 = arith.select %85, %72, %86 : vector<4x256xi1>, vector<4x256xf32>
    %88 = arith.mulf %87, %71 : vector<4x256xf32>
    %89 = arith.truncf %88 : vector<4x256xf32> to vector<4x256xbf16>
    %90 = vector.extract_strided_slice %14 {offsets = [2, 0, 0], sizes = [1, 4, 4], strides = [1, 1, 1]} : vector<9x4x4xbf16> to vector<1x4x4xbf16>
    %91 = vector.shape_cast %90 : vector<1x4x4xbf16> to vector<4x4xbf16>
    %cst_36 = arith.constant dense<0.000000e+00> : vector<4x256xf32>
    %92 = tpu.matmul %91, %89, %cst_36 {dimension_numbers = #tpu.dot_dimension_numbers<[1], [0], [0], [1], [0, 0, 1, 1], [], []>} : vector<4x4xbf16>, vector<4x256xbf16>, vector<4x256xf32> -> vector<4x256xf32>
    %93 = arith.addf %68, %92 : vector<4x256xf32>
    %94 = vector.extract_strided_slice %13 {offsets = [3, 0, 0], sizes = [1, 4, 8], strides = [1, 1, 1]} : vector<9x4x8xbf16> to vector<1x4x8xbf16>
    %95 = vector.shape_cast %94 : vector<1x4x8xbf16> to vector<4x8xbf16>
    %cst_37 = arith.constant dense<0.000000e+00> : vector<4x256xf32>
    %96 = tpu.matmul %95, %9, %cst_37 {dimension_numbers = #tpu.dot_dimension_numbers<[1], [0], [0], [1], [0, 0, 1, 1], [], []>} : vector<4x8xbf16>, vector<8x256xbf16>, vector<4x256xf32> -> vector<4x256xf32>
    %c1_i32_38 = arith.constant 1 : i32
    %97 = tpu.dynamic_rotate %1 by %c1_i32_38 dim 1 : vector<4x256xf32>, i32 -> vector<4x256xf32>
    %c0_i32_39 = arith.constant 0 : i32
    %98 = vector.broadcast %c0_i32_39 : i32 to vector<1x256xi32>
    %99 = arith.cmpi sge, %10, %98 : vector<1x256xi32>
    %c16_i32_40 = arith.constant 16 : i32
    %100 = vector.broadcast %c16_i32_40 : i32 to vector<1x256xi32>
    %101 = arith.cmpi slt, %10, %100 : vector<1x256xi32>
    %102 = arith.andi %99, %101 : vector<1x256xi1>
    %c1_i32_41 = arith.constant 1 : i32
    %103 = vector.broadcast %c1_i32_41 : i32 to vector<1x256xi32>
    %104 = arith.cmpi sge, %11, %103 : vector<1x256xi32>
    %105 = arith.andi %102, %104 : vector<1x256xi1>
    %c17_i32_42 = arith.constant 17 : i32
    %106 = vector.broadcast %c17_i32_42 : i32 to vector<1x256xi32>
    %107 = arith.cmpi slt, %11, %106 : vector<1x256xi32>
    %108 = arith.andi %105, %107 : vector<1x256xi1>
    %cst_43 = arith.constant 0.000000e+00 : f32
    %109 = vector.shape_cast %108 : vector<1x256xi1> to vector<1x256xi1>
    %110 = vector.broadcast %109 : vector<1x256xi1> to vector<4x256xi1>
    %111 = vector.broadcast %cst_43 : f32 to vector<4x256xf32>
    %112 = arith.select %110, %97, %111 : vector<4x256xi1>, vector<4x256xf32>
    %113 = arith.mulf %112, %96 : vector<4x256xf32>
    %114 = arith.truncf %113 : vector<4x256xf32> to vector<4x256xbf16>
    %115 = vector.extract_strided_slice %14 {offsets = [3, 0, 0], sizes = [1, 4, 4], strides = [1, 1, 1]} : vector<9x4x4xbf16> to vector<1x4x4xbf16>
    %116 = vector.shape_cast %115 : vector<1x4x4xbf16> to vector<4x4xbf16>
    %cst_44 = arith.constant dense<0.000000e+00> : vector<4x256xf32>
    %117 = tpu.matmul %116, %114, %cst_44 {dimension_numbers = #tpu.dot_dimension_numbers<[1], [0], [0], [1], [0, 0, 1, 1], [], []>} : vector<4x4xbf16>, vector<4x256xbf16>, vector<4x256xf32> -> vector<4x256xf32>
    %118 = arith.addf %93, %117 : vector<4x256xf32>
    %119 = vector.extract_strided_slice %13 {offsets = [4, 0, 0], sizes = [1, 4, 8], strides = [1, 1, 1]} : vector<9x4x8xbf16> to vector<1x4x8xbf16>
    %120 = vector.shape_cast %119 : vector<1x4x8xbf16> to vector<4x8xbf16>
    %cst_45 = arith.constant dense<0.000000e+00> : vector<4x256xf32>
    %121 = tpu.matmul %120, %9, %cst_45 {dimension_numbers = #tpu.dot_dimension_numbers<[1], [0], [0], [1], [0, 0, 1, 1], [], []>} : vector<4x8xbf16>, vector<8x256xbf16>, vector<4x256xf32> -> vector<4x256xf32>
    %c0_i32_46 = arith.constant 0 : i32
    %122 = vector.broadcast %c0_i32_46 : i32 to vector<1x256xi32>
    %123 = arith.cmpi sge, %10, %122 : vector<1x256xi32>
    %c16_i32_47 = arith.constant 16 : i32
    %124 = vector.broadcast %c16_i32_47 : i32 to vector<1x256xi32>
    %125 = arith.cmpi slt, %10, %124 : vector<1x256xi32>
    %126 = arith.andi %123, %125 : vector<1x256xi1>
    %c0_i32_48 = arith.constant 0 : i32
    %127 = vector.broadcast %c0_i32_48 : i32 to vector<1x256xi32>
    %128 = arith.cmpi sge, %11, %127 : vector<1x256xi32>
    %129 = arith.andi %126, %128 : vector<1x256xi1>
    %c16_i32_49 = arith.constant 16 : i32
    %130 = vector.broadcast %c16_i32_49 : i32 to vector<1x256xi32>
    %131 = arith.cmpi slt, %11, %130 : vector<1x256xi32>
    %132 = arith.andi %129, %131 : vector<1x256xi1>
    %cst_50 = arith.constant 0.000000e+00 : f32
    %133 = vector.shape_cast %132 : vector<1x256xi1> to vector<1x256xi1>
    %134 = vector.broadcast %133 : vector<1x256xi1> to vector<4x256xi1>
    %135 = vector.broadcast %cst_50 : f32 to vector<4x256xf32>
    %136 = arith.select %134, %1, %135 : vector<4x256xi1>, vector<4x256xf32>
    %137 = arith.mulf %136, %121 : vector<4x256xf32>
    %138 = arith.truncf %137 : vector<4x256xf32> to vector<4x256xbf16>
    %139 = vector.extract_strided_slice %14 {offsets = [4, 0, 0], sizes = [1, 4, 4], strides = [1, 1, 1]} : vector<9x4x4xbf16> to vector<1x4x4xbf16>
    %140 = vector.shape_cast %139 : vector<1x4x4xbf16> to vector<4x4xbf16>
    %cst_51 = arith.constant dense<0.000000e+00> : vector<4x256xf32>
    %141 = tpu.matmul %140, %138, %cst_51 {dimension_numbers = #tpu.dot_dimension_numbers<[1], [0], [0], [1], [0, 0, 1, 1], [], []>} : vector<4x4xbf16>, vector<4x256xbf16>, vector<4x256xf32> -> vector<4x256xf32>
    %142 = arith.addf %118, %141 : vector<4x256xf32>
    %143 = vector.extract_strided_slice %13 {offsets = [5, 0, 0], sizes = [1, 4, 8], strides = [1, 1, 1]} : vector<9x4x8xbf16> to vector<1x4x8xbf16>
    %144 = vector.shape_cast %143 : vector<1x4x8xbf16> to vector<4x8xbf16>
    %cst_52 = arith.constant dense<0.000000e+00> : vector<4x256xf32>
    %145 = tpu.matmul %144, %9, %cst_52 {dimension_numbers = #tpu.dot_dimension_numbers<[1], [0], [0], [1], [0, 0, 1, 1], [], []>} : vector<4x8xbf16>, vector<8x256xbf16>, vector<4x256xf32> -> vector<4x256xf32>
    %c255_i32 = arith.constant 255 : i32
    %146 = tpu.dynamic_rotate %1 by %c255_i32 dim 1 : vector<4x256xf32>, i32 -> vector<4x256xf32>
    %c0_i32_53 = arith.constant 0 : i32
    %147 = vector.broadcast %c0_i32_53 : i32 to vector<1x256xi32>
    %148 = arith.cmpi sge, %10, %147 : vector<1x256xi32>
    %c16_i32_54 = arith.constant 16 : i32
    %149 = vector.broadcast %c16_i32_54 : i32 to vector<1x256xi32>
    %150 = arith.cmpi slt, %10, %149 : vector<1x256xi32>
    %151 = arith.andi %148, %150 : vector<1x256xi1>
    %c-1_i32_55 = arith.constant -1 : i32
    %152 = vector.broadcast %c-1_i32_55 : i32 to vector<1x256xi32>
    %153 = arith.cmpi sge, %11, %152 : vector<1x256xi32>
    %154 = arith.andi %151, %153 : vector<1x256xi1>
    %c15_i32_56 = arith.constant 15 : i32
    %155 = vector.broadcast %c15_i32_56 : i32 to vector<1x256xi32>
    %156 = arith.cmpi slt, %11, %155 : vector<1x256xi32>
    %157 = arith.andi %154, %156 : vector<1x256xi1>
    %cst_57 = arith.constant 0.000000e+00 : f32
    %158 = vector.shape_cast %157 : vector<1x256xi1> to vector<1x256xi1>
    %159 = vector.broadcast %158 : vector<1x256xi1> to vector<4x256xi1>
    %160 = vector.broadcast %cst_57 : f32 to vector<4x256xf32>
    %161 = arith.select %159, %146, %160 : vector<4x256xi1>, vector<4x256xf32>
    %162 = arith.mulf %161, %145 : vector<4x256xf32>
    %163 = arith.truncf %162 : vector<4x256xf32> to vector<4x256xbf16>
    %164 = vector.extract_strided_slice %14 {offsets = [5, 0, 0], sizes = [1, 4, 4], strides = [1, 1, 1]} : vector<9x4x4xbf16> to vector<1x4x4xbf16>
    %165 = vector.shape_cast %164 : vector<1x4x4xbf16> to vector<4x4xbf16>
    %cst_58 = arith.constant dense<0.000000e+00> : vector<4x256xf32>
    %166 = tpu.matmul %165, %163, %cst_58 {dimension_numbers = #tpu.dot_dimension_numbers<[1], [0], [0], [1], [0, 0, 1, 1], [], []>} : vector<4x4xbf16>, vector<4x256xbf16>, vector<4x256xf32> -> vector<4x256xf32>
    %167 = arith.addf %142, %166 : vector<4x256xf32>
    %168 = vector.extract_strided_slice %13 {offsets = [6, 0, 0], sizes = [1, 4, 8], strides = [1, 1, 1]} : vector<9x4x8xbf16> to vector<1x4x8xbf16>
    %169 = vector.shape_cast %168 : vector<1x4x8xbf16> to vector<4x8xbf16>
    %cst_59 = arith.constant dense<0.000000e+00> : vector<4x256xf32>
    %170 = tpu.matmul %169, %9, %cst_59 {dimension_numbers = #tpu.dot_dimension_numbers<[1], [0], [0], [1], [0, 0, 1, 1], [], []>} : vector<4x8xbf16>, vector<8x256xbf16>, vector<4x256xf32> -> vector<4x256xf32>
    %c241_i32 = arith.constant 241 : i32
    %171 = tpu.dynamic_rotate %1 by %c241_i32 dim 1 : vector<4x256xf32>, i32 -> vector<4x256xf32>
    %c-1_i32_60 = arith.constant -1 : i32
    %172 = vector.broadcast %c-1_i32_60 : i32 to vector<1x256xi32>
    %173 = arith.cmpi sge, %10, %172 : vector<1x256xi32>
    %c15_i32_61 = arith.constant 15 : i32
    %174 = vector.broadcast %c15_i32_61 : i32 to vector<1x256xi32>
    %175 = arith.cmpi slt, %10, %174 : vector<1x256xi32>
    %176 = arith.andi %173, %175 : vector<1x256xi1>
    %c1_i32_62 = arith.constant 1 : i32
    %177 = vector.broadcast %c1_i32_62 : i32 to vector<1x256xi32>
    %178 = arith.cmpi sge, %11, %177 : vector<1x256xi32>
    %179 = arith.andi %176, %178 : vector<1x256xi1>
    %c17_i32_63 = arith.constant 17 : i32
    %180 = vector.broadcast %c17_i32_63 : i32 to vector<1x256xi32>
    %181 = arith.cmpi slt, %11, %180 : vector<1x256xi32>
    %182 = arith.andi %179, %181 : vector<1x256xi1>
    %cst_64 = arith.constant 0.000000e+00 : f32
    %183 = vector.shape_cast %182 : vector<1x256xi1> to vector<1x256xi1>
    %184 = vector.broadcast %183 : vector<1x256xi1> to vector<4x256xi1>
    %185 = vector.broadcast %cst_64 : f32 to vector<4x256xf32>
    %186 = arith.select %184, %171, %185 : vector<4x256xi1>, vector<4x256xf32>
    %187 = arith.mulf %186, %170 : vector<4x256xf32>
    %188 = arith.truncf %187 : vector<4x256xf32> to vector<4x256xbf16>
    %189 = vector.extract_strided_slice %14 {offsets = [6, 0, 0], sizes = [1, 4, 4], strides = [1, 1, 1]} : vector<9x4x4xbf16> to vector<1x4x4xbf16>
    %190 = vector.shape_cast %189 : vector<1x4x4xbf16> to vector<4x4xbf16>
    %cst_65 = arith.constant dense<0.000000e+00> : vector<4x256xf32>
    %191 = tpu.matmul %190, %188, %cst_65 {dimension_numbers = #tpu.dot_dimension_numbers<[1], [0], [0], [1], [0, 0, 1, 1], [], []>} : vector<4x4xbf16>, vector<4x256xbf16>, vector<4x256xf32> -> vector<4x256xf32>
    %192 = arith.addf %167, %191 : vector<4x256xf32>
    %193 = vector.extract_strided_slice %13 {offsets = [7, 0, 0], sizes = [1, 4, 8], strides = [1, 1, 1]} : vector<9x4x8xbf16> to vector<1x4x8xbf16>
    %194 = vector.shape_cast %193 : vector<1x4x8xbf16> to vector<4x8xbf16>
    %cst_66 = arith.constant dense<0.000000e+00> : vector<4x256xf32>
    %195 = tpu.matmul %194, %9, %cst_66 {dimension_numbers = #tpu.dot_dimension_numbers<[1], [0], [0], [1], [0, 0, 1, 1], [], []>} : vector<4x8xbf16>, vector<8x256xbf16>, vector<4x256xf32> -> vector<4x256xf32>
    %c240_i32 = arith.constant 240 : i32
    %196 = tpu.dynamic_rotate %1 by %c240_i32 dim 1 : vector<4x256xf32>, i32 -> vector<4x256xf32>
    %c-1_i32_67 = arith.constant -1 : i32
    %197 = vector.broadcast %c-1_i32_67 : i32 to vector<1x256xi32>
    %198 = arith.cmpi sge, %10, %197 : vector<1x256xi32>
    %c15_i32_68 = arith.constant 15 : i32
    %199 = vector.broadcast %c15_i32_68 : i32 to vector<1x256xi32>
    %200 = arith.cmpi slt, %10, %199 : vector<1x256xi32>
    %201 = arith.andi %198, %200 : vector<1x256xi1>
    %c0_i32_69 = arith.constant 0 : i32
    %202 = vector.broadcast %c0_i32_69 : i32 to vector<1x256xi32>
    %203 = arith.cmpi sge, %11, %202 : vector<1x256xi32>
    %204 = arith.andi %201, %203 : vector<1x256xi1>
    %c16_i32_70 = arith.constant 16 : i32
    %205 = vector.broadcast %c16_i32_70 : i32 to vector<1x256xi32>
    %206 = arith.cmpi slt, %11, %205 : vector<1x256xi32>
    %207 = arith.andi %204, %206 : vector<1x256xi1>
    %cst_71 = arith.constant 0.000000e+00 : f32
    %208 = vector.shape_cast %207 : vector<1x256xi1> to vector<1x256xi1>
    %209 = vector.broadcast %208 : vector<1x256xi1> to vector<4x256xi1>
    %210 = vector.broadcast %cst_71 : f32 to vector<4x256xf32>
    %211 = arith.select %209, %196, %210 : vector<4x256xi1>, vector<4x256xf32>
    %212 = arith.mulf %211, %195 : vector<4x256xf32>
    %213 = arith.truncf %212 : vector<4x256xf32> to vector<4x256xbf16>
    %214 = vector.extract_strided_slice %14 {offsets = [7, 0, 0], sizes = [1, 4, 4], strides = [1, 1, 1]} : vector<9x4x4xbf16> to vector<1x4x4xbf16>
    %215 = vector.shape_cast %214 : vector<1x4x4xbf16> to vector<4x4xbf16>
    %cst_72 = arith.constant dense<0.000000e+00> : vector<4x256xf32>
    %216 = tpu.matmul %215, %213, %cst_72 {dimension_numbers = #tpu.dot_dimension_numbers<[1], [0], [0], [1], [0, 0, 1, 1], [], []>} : vector<4x4xbf16>, vector<4x256xbf16>, vector<4x256xf32> -> vector<4x256xf32>
    %217 = arith.addf %192, %216 : vector<4x256xf32>
    %218 = vector.extract_strided_slice %13 {offsets = [8, 0, 0], sizes = [1, 4, 8], strides = [1, 1, 1]} : vector<9x4x8xbf16> to vector<1x4x8xbf16>
    %219 = vector.shape_cast %218 : vector<1x4x8xbf16> to vector<4x8xbf16>
    %cst_73 = arith.constant dense<0.000000e+00> : vector<4x256xf32>
    %220 = tpu.matmul %219, %9, %cst_73 {dimension_numbers = #tpu.dot_dimension_numbers<[1], [0], [0], [1], [0, 0, 1, 1], [], []>} : vector<4x8xbf16>, vector<8x256xbf16>, vector<4x256xf32> -> vector<4x256xf32>
    %c239_i32 = arith.constant 239 : i32
    %221 = tpu.dynamic_rotate %1 by %c239_i32 dim 1 : vector<4x256xf32>, i32 -> vector<4x256xf32>
    %c-1_i32_74 = arith.constant -1 : i32
    %222 = vector.broadcast %c-1_i32_74 : i32 to vector<1x256xi32>
    %223 = arith.cmpi sge, %10, %222 : vector<1x256xi32>
    %c15_i32_75 = arith.constant 15 : i32
    %224 = vector.broadcast %c15_i32_75 : i32 to vector<1x256xi32>
    %225 = arith.cmpi slt, %10, %224 : vector<1x256xi32>
    %226 = arith.andi %223, %225 : vector<1x256xi1>
    %c-1_i32_76 = arith.constant -1 : i32
    %227 = vector.broadcast %c-1_i32_76 : i32 to vector<1x256xi32>
    %228 = arith.cmpi sge, %11, %227 : vector<1x256xi32>
    %229 = arith.andi %226, %228 : vector<1x256xi1>
    %c15_i32_77 = arith.constant 15 : i32
    %230 = vector.broadcast %c15_i32_77 : i32 to vector<1x256xi32>
    %231 = arith.cmpi slt, %11, %230 : vector<1x256xi32>
    %232 = arith.andi %229, %231 : vector<1x256xi1>
    %cst_78 = arith.constant 0.000000e+00 : f32
    %233 = vector.shape_cast %232 : vector<1x256xi1> to vector<1x256xi1>
    %234 = vector.broadcast %233 : vector<1x256xi1> to vector<4x256xi1>
    %235 = vector.broadcast %cst_78 : f32 to vector<4x256xf32>
    %236 = arith.select %234, %221, %235 : vector<4x256xi1>, vector<4x256xf32>
    %237 = arith.mulf %236, %220 : vector<4x256xf32>
    %238 = arith.truncf %237 : vector<4x256xf32> to vector<4x256xbf16>
    %239 = vector.extract_strided_slice %14 {offsets = [8, 0, 0], sizes = [1, 4, 4], strides = [1, 1, 1]} : vector<9x4x4xbf16> to vector<1x4x4xbf16>
    %240 = vector.shape_cast %239 : vector<1x4x4xbf16> to vector<4x4xbf16>
    %cst_79 = arith.constant dense<0.000000e+00> : vector<4x256xf32>
    %241 = tpu.matmul %240, %238, %cst_79 {dimension_numbers = #tpu.dot_dimension_numbers<[1], [0], [0], [1], [0, 0, 1, 1], [], []>} : vector<4x4xbf16>, vector<4x256xbf16>, vector<4x256xf32> -> vector<4x256xf32>
    %242 = arith.addf %217, %241 : vector<4x256xf32>
    %c0_80 = arith.constant 0 : index
    %c0_81 = arith.constant 0 : index
    %c0_82 = arith.constant 0 : index
    %243 = vector.load %arg8[%c0_80, %c0_81, %c0_82] : memref<1x4x256xf32, #tpu.memory_space<vmem>>, vector<1x4x256xf32>
    %244 = vector.shape_cast %243 : vector<1x4x256xf32> to vector<4x256xf32>
    %245 = vector.shape_cast %242 : vector<4x256xf32> to vector<1x4x256xf32>
    tpu.vector_store %arg8[%c0_80, %c0_81, %c0_82], %245 {strides = array<i32>} : memref<1x4x256xf32, #tpu.memory_space<vmem>>, vector<1x4x256xf32>,
    return
  }
  func.func @transform_0(%arg0: i32) -> (i32, i32, i32) {
    %c0_i32 = arith.constant 0 : i32
    %c0_i32_0 = arith.constant 0 : i32
    %c0_i32_1 = arith.constant 0 : i32
    return %arg0, %c0_i32, %c0_i32_0 : i32, i32, i32
  }
  func.func @transform_1(%arg0: i32) -> (i32, i32) {
    %c0_i32 = arith.constant 0 : i32
    %c0_i32_0 = arith.constant 0 : i32
    %c0_i32_1 = arith.constant 0 : i32
    return %c0_i32, %c0_i32_0 : i32, i32
  }
  func.func @transform_2(%arg0: i32) -> (i32, i32) {
    %c0_i32 = arith.constant 0 : i32
    %c0_i32_0 = arith.constant 0 : i32
    %c0_i32_1 = arith.constant 0 : i32
    return %c0_i32, %c0_i32_0 : i32, i32
  }
  func.func @transform_3(%arg0: i32) -> (i32, i32, i32) {
    %c0_i32 = arith.constant 0 : i32
    %c0_i32_0 = arith.constant 0 : i32
    %c0_i32_1 = arith.constant 0 : i32
    return %arg0, %c0_i32, %c0_i32_0 : i32, i32, i32
  }
  func.func @transform_4(%arg0: i32) -> (i32, i32, i32, i32) {
    %c0_i32 = arith.constant 0 : i32
    %c0_i32_0 = arith.constant 0 : i32
    %c0_i32_1 = arith.constant 0 : i32
    %c0_i32_2 = arith.constant 0 : i32
    return %arg0, %c0_i32, %c0_i32_0, %c0_i32_1 : i32, i32, i32, i32
  }
  func.func @transform_5(%arg0: i32) -> (i32, i32, i32) {
    %c0_i32 = arith.constant 0 : i32
    %c0_i32_0 = arith.constant 0 : i32
    %c0_i32_1 = arith.constant 0 : i32
    return %arg0, %c0_i32, %c0_i32_0 : i32, i32, i32
  }
  func.func @transform_6(%arg0: i32) -> (i32, i32, i32) {
    %c0_i32 = arith.constant 0 : i32
    %c0_i32_0 = arith.constant 0 : i32
    %c0_i32_1 = arith.constant 0 : i32
    %c0_i32_2 = arith.constant 0 : i32
    return %c0_i32, %c0_i32_0, %c0_i32_1 : i32, i32, i32
  }
  func.func @transform_7(%arg0: i32) -> (i32, i32, i32) {
    %c0_i32 = arith.constant 0 : i32
    %c0_i32_0 = arith.constant 0 : i32
    %c0_i32_1 = arith.constant 0 : i32
    return %arg0, %c0_i32, %c0_i32_0 : i32, i32, i32
  }
}

</mosaic_0001>

<bundles_post_ra>
// kernel: cancrb_down_forward.1
= control target key start
LH: loop header
LB: loop body
LE: loop exit
PB: predicated region body
PF: predicated region fallthrough
CT: control target
= control target key end

     0   :  { %s1505_s24 = smov 0   ;;  %s1806_s0 = inlined_call_operand.vmem [shape: s32[2,1,256], index: 0, kind: input, shape index: {}]   ;;  %s1807_s1 = inlined_call_operand.vmem [shape: s32[1,256], index: 1, kind: input, shape index: {}]   ;;  %s1808_s2 = inlined_call_operand.vmem [shape: s32[1,256], index: 2, kind: input, shape index: {}]   ;;  %s1809_s3 = inlined_call_operand.vmem [shape: f32[2,4,256], index: 3, kind: input, shape index: {}]   ;;  %s1810_s4 = inlined_call_operand.vmem [shape: bf16[2,9,4,8], index: 4, kind: input, shape index: {}]   ;;  %s1811_s5 = inlined_call_operand.vmem [shape: bf16[2,4,8], index: 5, kind: input, shape index: {}]   ;;  %s1812_s6 = inlined_call_operand.vmem [shape: bf16[9,4,4], index: 6, kind: input, shape index: {}]   ;;  %s1813_s7 = inlined_call_operand.vmem [shape: f32[2,4,256], index: 7, kind: output, shape index: {}]  }
   0x1 LB: > { %s1372_s25 = sadd.s32 4294967295, %s1453_s24   ;;  %p1376_p0 = scmp.ge.s32.totalorder %s1453_s24, 1  ;;  %s1453_s24 = sphi %s1505_s24, %s17_s24  }
   0x2   : > { %p265_p1 = scmp.lt.s32.totalorder %s1453_s24, 3 }
   0x4   : > { %p266_p2 = pnand %p1376_p0, %p265_p1 }
   0x5   : > { %p310_p3 = scmp.lt.s32.totalorder (!%p266_p2), %s1372_s25, 1  ;;  %s1456_s15 = smov (!%p266_p2), 17  }
   0x6   : > { %269 = sbr.rel (%p266_p2) target bundleno = 428 (0x1ac), region = 48  ;;  %s1457_s16 = smov (!%p266_p2), 16  }
   0x7   : > { %s1458_s17 = smov (!%p266_p2), 15   ;;  %s1459_s18 = smov (!%p266_p2), 1  }
   0x8   : > { %s1460_s19 = smov (!%p266_p2), 127   ;;  %s1461_s20 = smov (!%p266_p2), 113  }
   0x9   : > { %s1462_s28 = smov (!%p266_p2), 112   ;;  %s1463_s9 = smov (!%p266_p2), 111  }
   0xb   : > { %v335_v0 = vlaneseq  ;;  %s1821_s25 = smov (!%p310_p3, %s1372_s25), 1  ;;  %v1455_v6 = vmov 0.0   ;;  %vm373_vm2 = vcmask 1043456   ;;  %vm369_vm3 = vcmask 64512   ;;  %v1606_v37 = vld [vmem:[%s1807_s1] sm:$0x3] }
   0xc   : > { %s1377_s26 = sshll.u32 %s1821_s25, 1  ;;  %s1426_s27 = sshll.u32 %s1821_s25, 3  ;;  %v1612_v40 = vld [vmem:[%s1808_s2] sm:$0x3]  ;;  %vm456_vm4 = vcmp.ge.s32.totalorder %v1606_v37, 1  ;;  %vm457_vm5 = vcmp.lt.s32.totalorder %v1606_v37, 17 }
   0xd   : > { %s313_s30 = scalar_lea.vmem %s1806_s0, %s1377_s26  ;;  %s318_s10 = scalar_lea.vmem %s1809_s3, %s1426_s27  ;;  %v336_v1 = vshrl.u32 %v335_v0, 7  ;;  %vm1619_vm6 = vmand %vm456_vm4, %vm457_vm5  ;;  %vm459_vm7 = vcmp.ge.s32.totalorder %v1612_v40, 1  ;;  %vm461_vm9 = vcmp.lt.s32.totalorder %v1612_v40, 17  ;;  %v1632_v43 = vand.u32 127, %v335_v0 }
   0xe   : > { %v1528_v2 = vld [vmem:[%s318_s10] sm:$0xff]  ;;  %s1428_s11 = smul.u32 18, %s1821_s25  ;;  %s327_s23 = scalar_lea.vmem %s1811_s5, %s1377_s26  ;;  %vm460_vm8 = vmand %vm1619_vm6, %vm459_vm7  ;;  %v1464_v44 = vmov 0   ;;  %vm558_vm12 = vcmp.ge.s32.totalorder %v1612_v40, 0  ;;  %vm474_vm4 = vcmask 31744  }
   0xf   : > { %v337_v3 = vld [vmem:[%s313_s30] sm:$0x3]  ;;  %442 = vst [vmem:[#allocation1] ss:$2 sm:$0xff] %v1528_v2  ;;  %vm462_vm10 = vmand %vm460_vm8, %vm461_vm9  ;;  %vm453_vm11 = vcmp.lt.s32.totalorder %v1632_v43, 17  ;;  %vm555_vm5 = vcmp.lt.s32.totalorder %v1632_v43, 16  ;;  %s332_s10 = scalar_lea.vmem %s1813_s7, %s1426_s27 }
  0x10   : > { %v338_v4 = vperm.slane %v337_v3, 0  ;;  %v339_v5 = vperm.slane %v337_v3, 1  ;;  %s1535_s14 = scalar_lea.vmem %s1810_s4, %s1428_s11  ;;  %v368_v33 = vld [vmem:[%s327_s23] sm:$0x3]  ;;  %v463_v45 = vsel %vm462_vm10, 1, %v1464_v44  ;;  %vm559_vm15 = vmand %vm1619_vm6, %vm558_vm12 }
  0x11   : > { %v350_v13 = vld [vmem:[%s1535_s14] sm:$0x3]  ;;  %v351_v18 = vld [vmem:[%s1535_s14 + $0x2] sm:$0x3]  ;;  %v352_v23 = vld [vmem:[%s1535_s14 + $0x4] sm:$0x3] }
  0x12   : > { %vm340_vm0 = vcmp.eq.s32.totalorder %v336_v1, %v338_v4  ;;  %vm341_vm1 = vcmp.eq.s32.totalorder %v336_v1, %v339_v5  ;;  %v353_v26 = vld [vmem:[%s1535_s14 + $0x6] sm:$0x3]  ;;  %v354_v29 = vld [vmem:[%s1535_s14 + $0x8] sm:$0x3]  ;;  %v355_v32 = vld [vmem:[%s1535_s14 + $0xa] sm:$0x3] }
  0x13   : > { %v1384_v7 = vsel %vm340_vm0, 1.0, %v1455_v6  ;;  %v1385_v8 = vsel %vm341_vm1, 1.0, %v1455_v6  ;;  %v356_v36 = vld [vmem:[%s1535_s14 + $0xc] sm:$0x3]  ;;  %v357_v39 = vld [vmem:[%s1535_s14 + $0xe] sm:$0x3] }
  0x14   : > { %v346_v9 = vpack.c.bf16 %v1384_v7, %v1384_v7  ;;  %v347_v10 = vpack.c.bf16 %v1385_v8, %v1385_v8  ;;  %v464_v46 = vperm.slane %v463_v45, 0  ;;  %v465_v47 = vperm.slane %v463_v45, 1  ;;  %v358_v49 = vld [vmem:[%s1535_s14 + $0x10] sm:$0x3]  ;;  %v359_v1 = vld [vmem:[%s1812_s6] sm:$0x3] }
  0x15   : > { %vm560_vm0 = vcmp.lt.s32.totalorder %v1612_v40, 16  ;;  %vm478_vm1 = vcmask 1041408  }
  0x16   : > { %v1538_v11 = vsel %vm373_vm2, %v346_v9, 0  ;;  %v1541_v12 = vsel %vm373_vm2, %v347_v10, 0  ;;  %v443_v14 = vld.sshfl [vmem:[#allocation1] sm:$0xff pattern:$0x75316420]  ;;  %vm466_vm13 = vcmp.eq.s32.totalorder %v464_v46, 1 }
  0x17   : > { %422 = vmatpush.bf16.msra.mxu2 %v1538_v11  ;;  %435 = vmatpush.bf16.msra.mxu3 %v1541_v12  ;;  %v444_v15 = vld.sshfl [vmem:[#allocation1 + $0x8] sm:$0xff pattern:$0x75316420]  ;;  %vm467_vm14 = vcmp.eq.s32.totalorder %v465_v47, 1 }
  0x18   : > { %447 = vrot.lane.b32.xlu0 %v443_v14, %s1456_s15  ;;  %546 = vst [vmem:[#allocation1] ss:$2 sm:$0xff] %v1528_v2  ;;  %400 = vmatpush.bf16.msra.mxu1 %v1541_v12 }
  0x19   : > { %387 = vmatpush.bf16.msra.mxu0 %v1538_v11 }
  0x1a   : > { %1388 = vmatmul.msk.bf16.vlgmr.msra.gmra.mxu2 %vm369_vm3, %v350_v13  ;;  %1389 = vmatmul.msk.bf16.vlgmr.msra.gmra.mxu3 %vm369_vm3, %v350_v13 }
  0x1b   : > { %527 = vmatpush.bf16.msrb.mxu2 %v1538_v11  ;;  %540 = vmatpush.bf16.msrb.mxu3 %v1541_v12 }
  0x1c   : > { %1387 = vmatmul.msk.bf16.vlgmr.msra.gmra.mxu1 %vm369_vm3, %v368_v33  ;;  %1386 = vmatmul.msk.bf16.vlgmr.msra.gmra.mxu0 %vm369_vm3, %v368_v33 }
  0x1f   : > { %624 = vmatpush.bf16.msra.mxu2 %v1538_v11  ;;  %637 = vmatpush.bf16.msra.mxu3 %v1541_v12  ;;  %v547_v16 = vld.sshfl [vmem:[#allocation1] sm:$0xff pattern:$0x75316420]  ;;  %v548_v17 = vld.sshfl [vmem:[#allocation1 + $0x8] sm:$0xff pattern:$0x75316420] }
  0x20   : > { %449 = vrot.lane.b32.xlu0 %v444_v15, %s1456_s15  ;;  %551 = vrot.lane.b32.xlu1 %v547_v16, %s1457_s16  ;;  %643 = vst [vmem:[#allocation1] ss:$2 sm:$0xff] %v1528_v2 }
  0x27   : > { %v644_v19 = vld.sshfl [vmem:[#allocation1] sm:$0xff pattern:$0x75316420]  ;;  %v645_v20 = vld.sshfl [vmem:[#allocation1 + $0x8] sm:$0xff pattern:$0x75316420] }
  0x28   : > { %553 = vrot.lane.b32.xlu1 %v548_v17, %s1457_s16  ;;  %740 = vst [vmem:[#allocation1] ss:$2 sm:$0xff] %v1528_v2  ;;  %648 = vrot.lane.b32.xlu2 %v644_v19, %s1458_s17 }
  0x2a   : > { %1392 = vmatmul.msk.bf16.vlgmr.msrb.gmra.mxu2 %vm369_vm3, %v351_v18  ;;  %1393 = vmatmul.msk.bf16.vlgmr.msrb.gmra.mxu3 %vm369_vm3, %v351_v18 }
  0x2b   : > { %721 = vmatpush.bf16.msrb.mxu2 %v1538_v11  ;;  %734 = vmatpush.bf16.msrb.mxu3 %v1541_v12 }
  0x2f   : > { %v742_v21 = vld.sshfl [vmem:[#allocation1 + $0x8] sm:$0xff pattern:$0x75316420]  ;;  %v741_v22 = vld.sshfl [vmem:[#allocation1] sm:$0xff pattern:$0x75316420] }
  0x30   : > { %747 = vrot.lane.b32.xlu1 %v742_v21, %s1459_s18  ;;  %745 = vrot.lane.b32.xlu0 %v741_v22, %s1459_s18  ;;  %845 = vst [vmem:[#allocation1] ss:$2 sm:$0xff] %v1528_v2  ;;  %v360_v21 = vld [vmem:[%s1812_s6 + $0x2] sm:$0x3] }
  0x31   : > { %650 = vrot.lane.b32.xlu2 %v645_v20, %s1458_s17 }
  0x37   : > { %v1566_v24 = vld.sshfl [vmem:[#allocation1] sm:$0xff pattern:$0x75316420]  ;;  %v1568_v25 = vld.sshfl [vmem:[#allocation1 + $0x8] sm:$0xff pattern:$0x75316420] }
  0x38   : > { %926 = vst [vmem:[#allocation1] ss:$2 sm:$0xff] %v1528_v2 }
  0x3a   : > { %1396 = vmatmul.msk.bf16.vlgmr.msra.gmra.mxu2 %vm369_vm3, %v352_v23  ;;  %1397 = vmatmul.msk.bf16.vlgmr.msra.gmra.mxu3 %vm369_vm3, %v352_v23 }
  0x3b   : > { %819 = vmatpush.bf16.msra.mxu2 %v1538_v11  ;;  %832 = vmatpush.bf16.msra.mxu3 %v1541_v12 }
  0x3f   : > { %v928_v27 = vld.sshfl [vmem:[#allocation1 + $0x8] sm:$0xff pattern:$0x75316420]  ;;  %v927_v28 = vld.sshfl [vmem:[#allocation1] sm:$0xff pattern:$0x75316420] }
  0x40   : > { %1021 = vst [vmem:[#allocation1] ss:$2 sm:$0xff] %v1528_v2  ;;  %933 = vrot.lane.b32.xlu0 %v928_v27, %s1460_s19  ;;  %931 = vrot.lane.b32.xlu2 %v927_v28, %s1460_s19 }
  0x47   : > { %v1022_v30 = vld.sshfl [vmem:[#allocation1] sm:$0xff pattern:$0x75316420]  ;;  %v1023_v31 = vld.sshfl [vmem:[#allocation1 + $0x8] sm:$0xff pattern:$0x75316420] }
  0x48   : > { %1119 = vst [vmem:[#allocation1] ss:$2 sm:$0xff] %v1528_v2  ;;  %1026 = vrot.lane.b32.xlu1 %v1022_v30, %s1461_s20  ;;  %1028 = vrot.lane.b32.xlu2 %v1023_v31, %s1461_s20 }
  0x4a   : > { %1400 = vmatmul.msk.bf16.vlgmr.msrb.gmra.mxu2 %vm369_vm3, %v353_v26  ;;  %1401 = vmatmul.msk.bf16.vlgmr.msrb.gmra.mxu3 %vm369_vm3, %v353_v26 }
  0x4b   : > { %907 = vmatpush.bf16.msrb.mxu2 %v1538_v11  ;;  %920 = vmatpush.bf16.msrb.mxu3 %v1541_v12 }
  0x4f   : > { %v1121_v34 = vld.sshfl [vmem:[#allocation1 + $0x8] sm:$0xff pattern:$0x75316420]  ;;  %v1120_v35 = vld.sshfl [vmem:[#allocation1] sm:$0xff pattern:$0x75316420] }
  0x50   : > { %1126 = vrot.lane.b32.xlu1 %v1121_v34, %s1462_s28  ;;  %1124 = vrot.lane.b32.xlu0 %v1120_v35, %s1462_s28  ;;  %1214 = vst [vmem:[#allocation1] ss:$2 sm:$0xff] %v1528_v2 }
  0x57   : > { %v1216_v38 = vld.sshfl [vmem:[#allocation1 + $0x8] sm:$0xff pattern:$0x75316420]  ;;  %v1215_v61 = vld.sshfl [vmem:[#allocation1] sm:$0xff pattern:$0x75316420] }
  0x58   : > { %1221 = vrot.lane.b32.xlu0 %v1216_v38, %s1463_s9  ;;  %1219 = vrot.lane.b32.xlu2 %v1215_v61, %s1463_s9 }
  0x5a   : > { %1404 = vmatmul.msk.bf16.vlgmr.msra.gmra.mxu2 %vm369_vm3, %v354_v29  ;;  %1405 = vmatmul.msk.bf16.vlgmr.msra.gmra.mxu3 %vm369_vm3, %v354_v29 }
  0x5b   : > { %1002 = vmatpush.bf16.msra.mxu2 %v1538_v11  ;;  %1015 = vmatpush.bf16.msra.mxu3 %v1541_v12 }
  0x6a   : > { %1408 = vmatmul.msk.bf16.vlgmr.msrb.gmra.mxu2 %vm369_vm3, %v355_v32  ;;  %1409 = vmatmul.msk.bf16.vlgmr.msrb.gmra.mxu3 %vm369_vm3, %v355_v32 }
  0x6b   : > { %1100 = vmatpush.bf16.msrb.mxu2 %v1538_v11  ;;  %1113 = vmatpush.bf16.msrb.mxu3 %v1541_v12 }
  0x7a   : > { %1412 = vmatmul.msk.bf16.vlgmr.msra.gmra.mxu2 %vm369_vm3, %v356_v36  ;;  %1413 = vmatmul.msk.bf16.vlgmr.msra.gmra.mxu3 %vm369_vm3, %v356_v36 }
  0x7b   : > { %1195 = vmatpush.bf16.msra.mxu2 %v1538_v11  ;;  %1208 = vmatpush.bf16.msra.mxu3 %v1541_v12 }
  0x82   : > { %v649_v10 = vpop.permute.xlu2 %648 }
  0x8a   : > { %1416 = vmatmul.msk.bf16.vlgmr.msrb.gmra.mxu2 %vm369_vm3, %v357_v39  ;;  %1417 = vmatmul.msk.bf16.vlgmr.msrb.gmra.mxu3 %vm369_vm3, %v357_v39  ;;  %v448_v42 = vpop.permute.xlu0 %447 }
  0x8b   : > { %v651_v29 = vpop.permute.xlu2 %650 }
  0x92   : > { %v450_v48 = vpop.permute.xlu0 %449  ;;  %v552_v52 = vpop.permute.xlu1 %551 }
  0x93   : > { %v454_v50 = vsel %vm453_vm11, %v448_v42, %v450_v48  ;;  %v455_v51 = vsel %vm453_vm11, %v450_v48, %v448_v42  ;;  %vm655_vm11 = vcmp.ge.s32.totalorder %v1612_v40, 4294967295  ;;  %v361_v48 = vld [vmem:[%s1812_s6 + $0x4] sm:$0x3] }
  0x94   : > { %v468_v54 = vsel %vm466_vm13, %v455_v51, 0.0  ;;  %v469_v56 = vsel %vm467_vm14, %v454_v50, 0.0  ;;  %vm656_vm13 = vmand %vm1619_vm6, %vm655_vm11  ;;  %vm657_vm14 = vcmp.lt.s32.totalorder %v1612_v40, 15  ;;  %vm752_vm6 = vcmp.ge.s32.totalorder %v1606_v37, 0 }
  0x9a   : > { %1420 = vmatmul.msk.bf16.vlgmr.msra.gmra.mxu2 %vm369_vm3, %v358_v49  ;;  %1421 = vmatmul.msk.bf16.vlgmr.msra.gmra.mxu3 %vm369_vm3, %v358_v49  ;;  %vm561_vm3 = vmand %vm559_vm15, %vm560_vm0  ;;  %v554_v7 = vpop.permute.xlu1 %553 }
  0x9b   : > { %v562_v0 = vsel %vm561_vm3, 1, %v1464_v44  ;;  %v556_v8 = vsel %vm555_vm5, %v552_v52, %v554_v7  ;;  %v557_v9 = vsel %vm555_vm5, %v554_v7, %v552_v52  ;;  %vm658_vm15 = vmand %vm656_vm13, %vm657_vm14  ;;  %vm753_vm3 = vcmp.lt.s32.totalorder %v1606_v37, 16 }
  0x9c   : > { %v563_v5 = vperm.slane %v562_v0, 0  ;;  %v564_v6 = vperm.slane %v562_v0, 1  ;;  %v659_v22 = vsel %vm658_vm15, 1, %v1464_v44  ;;  %vm652_vm5 = vcmp.lt.s32.totalorder %v1632_v43, 15 }
  0x9d   : > { %v424_v53 = vpop.f32.mrf.mxu2  ;;  %v437_v55 = vpop.f32.mrf.mxu3  ;;  %v660_v27 = vperm.slane %v659_v22, 0  ;;  %v661_v28 = vperm.slane %v659_v22, 1  ;;  %v653_v31 = vsel %vm652_vm5, %v649_v10, %v651_v29  ;;  %v654_v32 = vsel %vm652_vm5, %v651_v29, %v649_v10 }
  0x9e   : > { %v470_v57 = vmul.f32 %v468_v54, %v424_v53  ;;  %v471_v58 = vmul.f32 %v469_v56, %v437_v55  ;;  %vm565_vm8 = vcmp.eq.s32.totalorder %v563_v5, 1  ;;  %vm566_vm10 = vcmp.eq.s32.totalorder %v564_v6, 1  ;;  %v362_v5 = vld [vmem:[%s1812_s6 + $0x6] sm:$0x3] }
  0x9f   : > { %v567_v12 = vsel %vm565_vm8, %v557_v9, 0.0  ;;  %v568_v14 = vsel %vm566_vm10, %v556_v8, 0.0  ;;  %vm1676_vm8 = vmand %vm752_vm6, %vm753_vm3  ;;  %vm662_vm10 = vcmp.eq.s32.totalorder %v660_v27, 1  ;;  %vm663_vm13 = vcmp.eq.s32.totalorder %v661_v28, 1 }
  0xa0   : > { %v472_v59 = vpack.c.bf16 %v470_v57, %v470_v57  ;;  %v473_v60 = vpack.c.bf16 %v471_v58, %v471_v58  ;;  %vm755_vm15 = vmand %vm1676_vm8, %vm459_vm7  ;;  %v664_v34 = vsel %vm662_vm10, %v654_v32, 0.0  ;;  %v665_v36 = vsel %vm663_vm13, %v653_v31, 0.0 }
  0xa1   : > { %vm756_vm6 = vmand %vm755_vm15, %vm461_vm9  ;;  %vm749_vm3 = vcmp.lt.s32.totalorder %v1632_v43, 1 }
  0xa2   : > { %v480_v62 = vsel %vm478_vm1, %v472_v59, 0  ;;  %v483_v63 = vsel %vm478_vm1, %v473_v60, 0  ;;  %v757_v45 = vsel %vm756_vm6, 1, %v1464_v44  ;;  %v748_v49 = vpop.permute.xlu1 %747  ;;  %v746_v50 = vpop.permute.xlu0 %745  ;;  %vm838_vm13 = vmand %vm1676_vm8, %vm558_vm12 }
  0xa3   : > { %492 = vmatpush.bf16.msrb.mxu0 %v480_v62  ;;  %505 = vmatpush.bf16.msrb.mxu1 %v483_v63  ;;  %v758_v51 = vperm.slane %v757_v45, 0  ;;  %v759_v52 = vperm.slane %v757_v45, 1  ;;  %v750_v55 = vsel %vm749_vm3, %v746_v50, %v748_v49  ;;  %v751_v56 = vsel %vm749_vm3, %v748_v49, %v746_v50  ;;  %vm839_vm15 = vmand %vm838_vm13, %vm560_vm0 }
  0xa4   : > { %vm1033_vm13 = vcmp.ge.s32.totalorder %v1606_v37, 4294967295 }
  0xa5   : > { %v426_v3 = vpop.f32.mrf.mxu2  ;;  %v439_v4 = vpop.f32.mrf.mxu3  ;;  %vm760_vm5 = vcmp.eq.s32.totalorder %v758_v51, 1  ;;  %vm761_vm10 = vcmp.eq.s32.totalorder %v759_v52, 1 }
  0xa6   : > { %1391 = vmatmul.msk.bf16.vlgmr.msrb.gmra.mxu1 %vm474_vm4, %v359_v1  ;;  %1390 = vmatmul.msk.bf16.vlgmr.msrb.gmra.mxu0 %vm474_vm4, %v359_v1  ;;  %v762_v57 = vsel %vm760_vm5, %v751_v56, 0.0  ;;  %v763_v58 = vsel %vm761_vm10, %v750_v55, 0.0  ;;  %v840_v1 = vsel %vm839_vm15, 1, %v1464_v44  ;;  %vm938_vm5 = vmand %vm1676_vm8, %vm655_vm11  ;;  %vm935_vm8 = vcmp.lt.s32.totalorder %v1632_v43, 127 }
  0xa7   : > { %v841_v6 = vperm.slane %v840_v1, 0  ;;  %v842_v7 = vperm.slane %v840_v1, 1  ;;  %vm939_vm10 = vmand %vm938_vm5, %vm657_vm14  ;;  %vm1034_vm15 = vcmp.lt.s32.totalorder %v1606_v37, 15  ;;  %v402_v37 = vpop.f32.mrf.mxu1 }
  0xa8   : > { %vm1728_vm5 = vmand %vm1033_vm13, %vm1034_vm15 }
  0xa9   : > { %vm843_vm6 = vcmp.eq.s32.totalorder %v841_v6, 1  ;;  %vm844_vm3 = vcmp.eq.s32.totalorder %v842_v7, 1  ;;  %vm1131_vm15 = vmand %vm1728_vm5, %vm558_vm12  ;;  %vm1128_vm12 = vcmp.lt.s32.totalorder %v1632_v43, 112 }
  0xaa   : > { %v850_v10 = vsel %vm843_vm6, %v1566_v24, 0.0 }
  0xad   : > { %v529_v11 = vpop.f32.mrf.mxu2  ;;  %v542_v13 = vpop.f32.mrf.mxu3 }
  0xae   : > { %v569_v15 = vmul.f32 %v567_v12, %v529_v11  ;;  %v570_v16 = vmul.f32 %v568_v14, %v542_v13  ;;  %v851_v11 = vsel %vm844_vm3, %v1568_v25, 0.0 }
  0xaf   : > { %v404_v49 = vpop.f32.mrf.mxu1 }
  0xb0   : > { %v571_v17 = vpack.c.bf16 %v569_v15, %v569_v15  ;;  %v572_v18 = vpack.c.bf16 %v570_v16, %v570_v16  ;;  %v367_v49 = vld [vmem:[%s1812_s6 + $0x10] sm:$0x3] }
  0xb2   : > { %v577_v19 = vsel %vm478_vm1, %v571_v17, 0  ;;  %v580_v20 = vsel %vm478_vm1, %v572_v18, 0  ;;  %v940_v18 = vsel %vm939_vm10, 1, %v1464_v44  ;;  %vm1036_vm10 = vmand %vm1728_vm5, %vm459_vm7  ;;  %vm1030_vm7 = vcmp.lt.s32.totalorder %v1632_v43, 113 }
  0xb3   : > { %589 = vmatpush.bf16.msra.mxu0 %v577_v19  ;;  %602 = vmatpush.bf16.msra.mxu1 %v580_v20  ;;  %v363_v19 = vld [vmem:[%s1812_s6 + $0x8] sm:$0x3]  ;;  %v934_v20 = vpop.permute.xlu0 %933  ;;  %v941_v22 = vperm.slane %v940_v18, 0 }
  0xb5   : > { %v531_v23 = vpop.f32.mrf.mxu2  ;;  %v544_v26 = vpop.f32.mrf.mxu3  ;;  %vm943_vm6 = vcmp.eq.s32.totalorder %v941_v22, 1 }
  0xb6   : > { %1395 = vmatmul.msk.bf16.vlgmr.msra.gmra.mxu1 %vm474_vm4, %v360_v21  ;;  %1394 = vmatmul.msk.bf16.vlgmr.msra.gmra.mxu0 %vm474_vm4, %v360_v21  ;;  %v932_v21 = vpop.permute.xlu2 %931  ;;  %v942_v23 = vperm.slane %v940_v18, 1 }
  0xb7   : > { %v936_v28 = vsel %vm935_vm8, %v932_v21, %v934_v20  ;;  %v937_v29 = vsel %vm935_vm8, %v934_v20, %v932_v21  ;;  %vm1037_vm8 = vmand %vm1036_vm10, %vm461_vm9 }
  0xb8   : > { %vm944_vm3 = vcmp.eq.s32.totalorder %v942_v23, 1  ;;  %v945_v31 = vsel %vm943_vm6, %v936_v28, 0.0  ;;  %vm1132_vm6 = vmand %vm1131_vm15, %vm560_vm0  ;;  %v366_v28 = vld [vmem:[%s1812_s6 + $0xe] sm:$0x3] }
  0xb9   : > { %v946_v32 = vsel %vm944_vm3, %v937_v29, 0.0  ;;  %vm1226_vm10 = vmand %vm1728_vm5, %vm655_vm11  ;;  %vm1223_vm11 = vcmp.lt.s32.totalorder %v1632_v43, 111 }
  0xba   : > { %v1027_v52 = vpop.permute.xlu1 %1026 }
  0xbd   : > { %v626_v33 = vpop.f32.mrf.mxu2  ;;  %v639_v35 = vpop.f32.mrf.mxu3 }
  0xbe   : > { %v666_v38 = vmul.f32 %v664_v34, %v626_v33  ;;  %v667_v39 = vmul.f32 %v665_v36, %v639_v35  ;;  %v389_v33 = vpop.f32.mrf.mxu0  ;;  %v1029_v51 = vpop.permute.xlu2 %1028 }
  0xc0   : > { %v668_v41 = vpack.c.bf16 %v666_v38, %v666_v38  ;;  %v669_v42 = vpack.c.bf16 %v667_v39, %v667_v39 }
  0xc2   : > { %v674_v46 = vsel %vm478_vm1, %v668_v41, 0  ;;  %v677_v47 = vsel %vm478_vm1, %v669_v42, 0  ;;  %v1038_v42 = vsel %vm1037_vm8, 1, %v1464_v44  ;;  %vm1227_vm8 = vmand %vm1226_vm10, %vm657_vm14 }
  0xc3   : > { %686 = vmatpush.bf16.msrb.mxu0 %v674_v46  ;;  %699 = vmatpush.bf16.msrb.mxu1 %v677_v47  ;;  %v408_v47 = vrot.slane %v402_v37, 4  ;;  %v1228_v23 = vsel %vm1227_vm8, 1, %v1464_v44 }
  0xc5   : > { %v628_v53 = vpop.f32.mrf.mxu2  ;;  %v641_v54 = vpop.f32.mrf.mxu3  ;;  %v1745_v55 = vsel %vm373_vm2, %v389_v33, %v408_v47 }
  0xc6   : > { %1399 = vmatmul.msk.bf16.vlgmr.msrb.gmra.mxu1 %vm474_vm4, %v361_v48  ;;  %1398 = vmatmul.msk.bf16.vlgmr.msrb.gmra.mxu0 %vm474_vm4, %v361_v48  ;;  %v364_v48 = vld [vmem:[%s1812_s6 + $0xa] sm:$0x3]  ;;  %v391_v50 = vpop.f32.mrf.mxu0  ;;  %v1039_v53 = vperm.slane %v1038_v42, 0  ;;  %v1040_v54 = vperm.slane %v1038_v42, 1  ;;  %v1220_v30 = vpop.permute.xlu2 %1219 }
  0xc8   : > { %vm1041_vm9 = vcmp.eq.s32.totalorder %v1039_v53, 1  ;;  %vm1042_vm13 = vcmp.eq.s32.totalorder %v1040_v54, 1 }
  0xcd   : > { %v723_v59 = vpop.f32.mrf.mxu2  ;;  %v736_v60 = vpop.f32.mrf.mxu3 }
  0xce   : > { %v764_v61 = vmul.f32 %v762_v57, %v723_v59  ;;  %v765_v62 = vmul.f32 %v763_v58, %v736_v60  ;;  %v1031_v58 = vsel %vm1030_vm7, %v1027_v52, %v1029_v51  ;;  %v1032_v59 = vsel %vm1030_vm7, %v1029_v51, %v1027_v52 }
  0xcf   : > { %v1043_v60 = vsel %vm1041_vm9, %v1031_v58, 0.0  ;;  %v411_v51 = vadd.f32 %v1745_v55, %v1528_v2 }
  0xd0   : > { %v766_v63 = vpack.c.bf16 %v764_v61, %v764_v61  ;;  %v767_v0 = vpack.c.bf16 %v765_v62, %v765_v62  ;;  %v1044_v61 = vsel %vm1042_vm13, %v1032_v59, 0.0 }
  0xd2   : > { %v772_v3 = vsel %vm478_vm1, %v766_v63, 0  ;;  %v775_v4 = vsel %vm478_vm1, %v767_v0, 0 }
  0xd3   : > { %784 = vmatpush.bf16.msra.mxu0 %v772_v3  ;;  %797 = vmatpush.bf16.msra.mxu1 %v775_v4 }
  0xd5   : > { %v725_v8 = vpop.f32.mrf.mxu2  ;;  %v738_v9 = vpop.f32.mrf.mxu3 }
  0xd6   : > { %1403 = vmatmul.msk.bf16.vlgmr.msra.gmra.mxu1 %vm474_vm4, %v362_v5  ;;  %1402 = vmatmul.msk.bf16.vlgmr.msra.gmra.mxu0 %vm474_vm4, %v362_v5  ;;  %v1133_v5 = vsel %vm1132_vm6, 1, %v1464_v44  ;;  %v365_v8 = vld [vmem:[%s1812_s6 + $0xc] sm:$0x3]  ;;  %v1127_v9 = vpop.permute.xlu1 %1126 }
  0xdd   : > { %v821_v12 = vpop.f32.mrf.mxu2  ;;  %v834_v13 = vpop.f32.mrf.mxu3 }
  0xde   : > { %v852_v14 = vmul.f32 %v850_v10, %v821_v12  ;;  %v853_v15 = vmul.f32 %v851_v11, %v834_v13  ;;  %v1125_v10 = vpop.permute.xlu0 %1124  ;;  %v1134_v11 = vperm.slane %v1133_v5, 0  ;;  %v1135_v12 = vperm.slane %v1133_v5, 1 }
  0xe0   : > { %v854_v16 = vpack.c.bf16 %v852_v14, %v852_v14  ;;  %v855_v17 = vpack.c.bf16 %v853_v15, %v853_v15  ;;  %v1129_v15 = vsel %vm1128_vm12, %v1125_v10, %v1127_v9  ;;  %vm1136_vm0 = vcmp.eq.s32.totalorder %v1134_v11, 1 }
  0xe1   : > { %vm1137_vm3 = vcmp.eq.s32.totalorder %v1135_v12, 1 }
  0xe2   : > { %v860_v24 = vsel %vm478_vm1, %v854_v16, 0  ;;  %v863_v25 = vsel %vm478_vm1, %v855_v17, 0  ;;  %v1130_v16 = vsel %vm1128_vm12, %v1127_v9, %v1125_v10  ;;  %v1138_v17 = vsel %vm1136_vm0, %v1129_v15, 0.0 }
  0xe3   : > { %872 = vmatpush.bf16.msrb.mxu0 %v860_v24  ;;  %885 = vmatpush.bf16.msrb.mxu1 %v863_v25  ;;  %v1139_v18 = vsel %vm1137_vm3, %v1130_v16, 0.0 }
  0xe5   : > { %v823_v26 = vpop.f32.mrf.mxu2  ;;  %v836_v27 = vpop.f32.mrf.mxu3 }
  0xe6   : > { %1407 = vmatmul.msk.bf16.vlgmr.msrb.gmra.mxu1 %vm474_vm4, %v363_v19  ;;  %1406 = vmatmul.msk.bf16.vlgmr.msrb.gmra.mxu0 %vm474_vm4, %v363_v19  ;;  %v1222_v29 = vpop.permute.xlu0 %1221 }
  0xe7   : > { %v1224_v44 = vsel %vm1223_vm11, %v1220_v30, %v1222_v29  ;;  %v1225_v33 = vsel %vm1223_vm11, %v1222_v29, %v1220_v30 }
  0xed   : > { %v909_v34 = vpop.f32.mrf.mxu2  ;;  %v922_v35 = vpop.f32.mrf.mxu3 }
  0xee   : > { %v947_v36 = vmul.f32 %v945_v31, %v909_v34  ;;  %v948_v38 = vmul.f32 %v946_v32, %v922_v35  ;;  %v1229_v31 = vperm.slane %v1228_v23, 0  ;;  %v1230_v32 = vperm.slane %v1228_v23, 1 }
  0xf0   : > { %v949_v39 = vpack.c.bf16 %v947_v36, %v947_v36  ;;  %v950_v41 = vpack.c.bf16 %v948_v38, %v948_v38  ;;  %vm1231_vm14 = vcmp.eq.s32.totalorder %v1229_v31, 1  ;;  %vm1232_vm5 = vcmp.eq.s32.totalorder %v1230_v32, 1 }
  0xf1   : > { %v1233_v34 = vsel %vm1231_vm14, %v1224_v44, 0.0  ;;  %v1234_v35 = vsel %vm1232_vm5, %v1225_v33, 0.0 }
  0xf2   : > { %v955_v45 = vsel %vm478_vm1, %v949_v39, 0  ;;  %v958_v46 = vsel %vm478_vm1, %v950_v41, 0 }
  0xf3   : > { %967 = vmatpush.bf16.msra.mxu0 %v955_v45  ;;  %980 = vmatpush.bf16.msra.mxu1 %v958_v46 }
  0xf5   : > { %v911_v56 = vpop.f32.mrf.mxu2  ;;  %v924_v57 = vpop.f32.mrf.mxu3 }
  0xf6   : > { %1411 = vmatmul.msk.bf16.vlgmr.msra.gmra.mxu1 %vm474_vm4, %v364_v48  ;;  %1410 = vmatmul.msk.bf16.vlgmr.msra.gmra.mxu0 %vm474_vm4, %v364_v48 }
  0xfd   : > { %v1004_v62 = vpop.f32.mrf.mxu2  ;;  %v1017_v63 = vpop.f32.mrf.mxu3 }
  0xfe   : > { %v1045_v0 = vmul.f32 %v1043_v60, %v1004_v62  ;;  %v1046_v1 = vmul.f32 %v1044_v61, %v1017_v63 }
 0x100   : > { %v1047_v3 = vpack.c.bf16 %v1045_v0, %v1045_v0  ;;  %v1048_v4 = vpack.c.bf16 %v1046_v1, %v1046_v1 }
 0x102   : > { %v1053_v6 = vsel %vm478_vm1, %v1047_v3, 0  ;;  %v1056_v7 = vsel %vm478_vm1, %v1048_v4, 0 }
 0x103   : > { %1065 = vmatpush.bf16.msrb.mxu0 %v1053_v6  ;;  %1078 = vmatpush.bf16.msrb.mxu1 %v1056_v7 }
 0x105   : > { %v1006_v13 = vpop.f32.mrf.mxu2  ;;  %v1019_v14 = vpop.f32.mrf.mxu3 }
 0x106   : > { %1415 = vmatmul.msk.bf16.vlgmr.msrb.gmra.mxu1 %vm474_vm4, %v365_v8  ;;  %1414 = vmatmul.msk.bf16.vlgmr.msrb.gmra.mxu0 %vm474_vm4, %v365_v8 }
 0x10d   : > { %v1102_v24 = vpop.f32.mrf.mxu2  ;;  %v1115_v25 = vpop.f32.mrf.mxu3 }
 0x10e   : > { %v1140_v19 = vmul.f32 %v1138_v17, %v1102_v24  ;;  %v1141_v20 = vmul.f32 %v1139_v18, %v1115_v25 }
 0x110   : > { %v1142_v21 = vpack.c.bf16 %v1140_v19, %v1140_v19  ;;  %v1143_v22 = vpack.c.bf16 %v1141_v20, %v1141_v20 }
 0x112   : > { %v1148_v26 = vsel %vm478_vm1, %v1142_v21, 0  ;;  %v1151_v27 = vsel %vm478_vm1, %v1143_v22, 0 }
 0x113   : > { %1160 = vmatpush.bf16.msra.mxu0 %v1148_v26  ;;  %1173 = vmatpush.bf16.msra.mxu1 %v1151_v27 }
 0x115   : > { %v1104_v40 = vpop.f32.mrf.mxu2  ;;  %v1117_v37 = vpop.f32.mrf.mxu3 }
 0x116   : > { %1419 = vmatmul.msk.bf16.vlgmr.msra.gmra.mxu1 %vm474_vm4, %v366_v28  ;;  %1418 = vmatmul.msk.bf16.vlgmr.msra.gmra.mxu0 %vm474_vm4, %v366_v28 }
 0x11d   : > { %v1197_v36 = vpop.f32.mrf.mxu2  ;;  %v1210_v38 = vpop.f32.mrf.mxu3 }
 0x11e   : > { %v1235_v39 = vmul.f32 %v1233_v34, %v1197_v36  ;;  %v1236_v41 = vmul.f32 %v1234_v35, %v1210_v38 }
 0x120   : > { %v1237_v42 = vpack.c.bf16 %v1235_v39, %v1235_v39  ;;  %v1238_v45 = vpack.c.bf16 %v1236_v41, %v1236_v41 }
 0x122   : > { %v1243_v46 = vsel %vm478_vm1, %v1237_v42, 0  ;;  %v1246_v43 = vsel %vm478_vm1, %v1238_v45, 0 }
 0x123   : > { %v507_v47 = vpop.f32.mrf.mxu1  ;;  %1255 = vmatpush.bf16.msrb.mxu0 %v1243_v46  ;;  %1268 = vmatpush.bf16.msrb.mxu1 %v1246_v43  ;;  %v494_v48 = vpop.f32.mrf.mxu0 }
 0x124   : > { %v513_v50 = vrot.slane %v507_v47, 4 }
 0x125   : > { %v1199_v52 = vpop.f32.mrf.mxu2  ;;  %v1212_v53 = vpop.f32.mrf.mxu3 }
 0x126   : > { %v514_v54 = vsel %vm373_vm2, %v494_v48, %v513_v50  ;;  %1423 = vmatmul.msk.bf16.vlgmr.msrb.gmra.mxu1 %vm474_vm4, %v367_v49  ;;  %1422 = vmatmul.msk.bf16.vlgmr.msrb.gmra.mxu0 %vm474_vm4, %v367_v49 }
 0x127   : > { %v516_v56 = vadd.f32 %v514_v54, %v411_v51 }
 0x12b   : > { %v509_v57 = vpop.f32.mrf.mxu1  ;;  %v496_v58 = vpop.f32.mrf.mxu0 }
 0x133   : > { %v604_v59 = vpop.f32.mrf.mxu1  ;;  %v591_v60 = vpop.f32.mrf.mxu0 }
 0x134   : > { %v610_v61 = vrot.slane %v604_v59, 4 }
 0x136   : > { %v611_v62 = vsel %vm373_vm2, %v591_v60, %v610_v61 }
 0x137   : > { %v613_v63 = vadd.f32 %v611_v62, %v516_v56 }
 0x13b   : > { %v606_v0 = vpop.f32.mrf.mxu1  ;;  %v593_v1 = vpop.f32.mrf.mxu0 }
 0x143   : > { %v701_v2 = vpop.f32.mrf.mxu1  ;;  %v688_v55 = vpop.f32.mrf.mxu0 }
 0x144   : > { %v707_v3 = vrot.slane %v701_v2, 4 }
 0x146   : > { %v708_v4 = vsel %vm373_vm2, %v688_v55, %v707_v3 }
 0x147   : > { %v710_v5 = vadd.f32 %v708_v4, %v613_v63 }
 0x14b   : > { %v703_v6 = vpop.f32.mrf.mxu1  ;;  %v690_v7 = vpop.f32.mrf.mxu0 }
 0x153   : > { %v799_v8 = vpop.f32.mrf.mxu1  ;;  %v786_v9 = vpop.f32.mrf.mxu0 }
 0x154   : > { %v805_v10 = vrot.slane %v799_v8, 4 }
 0x156   : > { %v806_v11 = vsel %vm373_vm2, %v786_v9, %v805_v10 }
 0x157   : > { %v808_v12 = vadd.f32 %v806_v11, %v710_v5 }
 0x15b   : > { %v801_v13 = vpop.f32.mrf.mxu1  ;;  %v788_v14 = vpop.f32.mrf.mxu0 }
 0x163   : > { %v887_v15 = vpop.f32.mrf.mxu1  ;;  %v874_v16 = vpop.f32.mrf.mxu0 }
 0x164   : > { %v893_v29 = vrot.slane %v887_v15, 4 }
 0x166   : > { %v894_v40 = vsel %vm373_vm2, %v874_v16, %v893_v29 }
 0x167   : > { %v896_v34 = vadd.f32 %v894_v40, %v808_v12 }
 0x16b   : > { %v889_v17 = vpop.f32.mrf.mxu1  ;;  %v876_v18 = vpop.f32.mrf.mxu0 }
 0x173   : > { %v982_v24 = vpop.f32.mrf.mxu1  ;;  %v969_v25 = vpop.f32.mrf.mxu0 }
 0x174   : > { %v988_v30 = vrot.slane %v982_v24, 4 }
 0x176   : > { %v989_v44 = vsel %vm373_vm2, %v969_v25, %v988_v30 }
 0x177   : > { %v991_v36 = vadd.f32 %v989_v44, %v896_v34 }
 0x17b   : > { %v984_v19 = vpop.f32.mrf.mxu1  ;;  %v971_v20 = vpop.f32.mrf.mxu0 }
 0x183   : > { %v1080_v21 = vpop.f32.mrf.mxu1  ;;  %v1067_v22 = vpop.f32.mrf.mxu0 }
 0x184   : > { %v1086_v37 = vrot.slane %v1080_v21, 4 }
 0x186   : > { %v1087_v35 = vsel %vm373_vm2, %v1067_v22, %v1086_v37 }
 0x187   : > { %v1089_v39 = vadd.f32 %v1087_v35, %v991_v36 }
 0x18b   : > { %v1082_v23 = vpop.f32.mrf.mxu1  ;;  %v1069_v26 = vpop.f32.mrf.mxu0 }
 0x193   : > { %v1175_v27 = vpop.f32.mrf.mxu1  ;;  %v1162_v28 = vpop.f32.mrf.mxu0 }
 0x194   : > { %v1181_v33 = vrot.slane %v1175_v27, 4 }
 0x196   : > { %v1182_v38 = vsel %vm373_vm2, %v1162_v28, %v1181_v33 }
 0x197   : > { %v1184_v46 = vadd.f32 %v1182_v38, %v1089_v39 }
 0x19b   : > { %v1177_v31 = vpop.f32.mrf.mxu1  ;;  %v1164_v32 = vpop.f32.mrf.mxu0 }
 0x1a3   : > { %v1270_v41 = vpop.f32.mrf.mxu1  ;;  %v1257_v42 = vpop.f32.mrf.mxu0 }
 0x1a4   : > { %v1276_v45 = vrot.slane %v1270_v41, 4 }
 0x1a6   : > { %v1277_v43 = vsel %vm373_vm2, %v1257_v42, %v1276_v45 }
 0x1a7   : > { %v1279_v47 = vadd.f32 %v1277_v43, %v1184_v46 }
 0x1a9   : > { %1280 = vst [vmem:[%s332_s10] sm:$0xff] %v1279_v47 }
 0x1ab   : > { %v1259_v48 = vpop.f32.mrf.mxu0  ;;  %v1272_v49 = vpop.f32.mrf.mxu1 }
 0x1ac PF: > { %s17_s24 = sadd.s32 1, %s1453_s24  }
 0x1ad   : > { %p14_p4 = scmp.ge.s32.totalorder %s17_s24, 4  }
 0x1af   :  { %16 = sbr.rel (!%p14_p4) target bundleno = 1 (0x1), region = 87 }

</bundles_post_ra>
